<compile_context>
chip_gen: v7x
topology: tpu7x:2x2x1
jax: 0.10.0
libtpu: 0.0.40
codegen_flags: <defaults>
</compile_context>

<pallas_src>
import jax
import jax.numpy as jnp
from jax.experimental import pallas as pl
from jax.experimental.pallas import tpu as pltpu


# ----------------------------- Attention kernel -----------------------------

def _make_attention_kernel(return_attention):
    def kernel(hproj_ref, enc_ref, cov_ref, we_ref, v_ref, *out_refs):
        if return_attention:
            ctx_ref, attn_ref, cov_out_ref = out_refs
        else:
            ctx_ref, cov_out_ref = out_refs

        hproj = hproj_ref[...]                     # (TB, H) f32, bias pre-added
        enc = enc_ref[...]                         # (TB, S, H) bf16
        cov = cov_ref[...]                         # (TB, S)    f32
        TB, S, H = enc.shape

        # Encoder projection: one (TB*S, H) @ (H, H) bf16 MXU matmul, f32 acc.
        enc_flat = enc.reshape(TB * S, H)
        eproj = jnp.dot(enc_flat, we_ref[...],
                        preferred_element_type=jnp.float32).reshape(TB, S, H)

        # energy = tanh(Linear(cat(hidden, enc)) + coverage)  (f32 elementwise)
        energy = jnp.tanh(eproj + hproj[:, None, :] + cov[:, :, None])

        # v-projection (N=1): VPU broadcast-multiply + XLU lane reduce.
        v_row = v_ref[...]                                     # (1, H) f32
        scores = jnp.sum(energy * v_row[None, :, :], axis=-1)  # (TB, S)

        # Exact softmax over the sequence (lane) axis — attention rows must sum
        # to 1 because coverage accumulates it across decode steps.
        m = jnp.max(scores, axis=-1, keepdims=True)
        ex = jnp.exp(scores - m)
        attn = ex / jnp.sum(ex, axis=-1, keepdims=True)        # (TB, S) f32

        if return_attention:
            attn_ref[...] = attn
        cov_out_ref[...] = cov + attn                          # coverage += attn

        # context = bmm(attention, enc): f32*bf16 broadcast multiply (promotes
        # to f32 on the VPU) + reduce over S; MXU stays free for the projection.
        ctx_ref[...] = jnp.sum(attn[:, :, None] * enc, axis=1)  # (TB, H) f32
    return kernel


def _vmem_capacity_bytes():
    try:
        return int(pltpu.get_tpu_info().vmem_capacity_bytes)
    except Exception:
        return 64 << 20          # assume v7x-sized VMEM if the query fails


def _pick_block_b(B, S, H):
    """Batch-tile size: as large as the VMEM budget allows, capped so the grid
    still has >= 2 parallel steps (megacore / two v7x TensorCores)."""
    vmem = _vmem_capacity_bytes()
    budget = vmem // 4                       # leave headroom for double-buffers
    # per batch row of a tile: enc bf16 double-buffered (2*S*H*2B) + ~3 enc-
    # sized f32 intermediates (eproj/energy, v-product, context staging).
    row_bytes = 16 * S * H + 64
    tb = int(min(budget // max(row_bytes, 1), 64))
    if B >= 16:
        tb = min(tb, -(-B // 2))             # keep num_tiles >= 2
    else:
        tb = min(tb, 8)
    tb = max(8, (tb // 8) * 8)               # f32 sublane multiple
    return tb


def attention_forward(hidden, encoder_outputs, coverage, wh, we, b, v,
                      *, block_b=None, return_attention=True):
    """hidden (B,H), encoder_outputs (B,S,H), coverage (B,S,1)
    -> context (B,H), attention (B,S) | None, coverage_out (B,S,1).
    wh/we are (H,H) (the cat-linear weight split and pre-transposed),
    b is (1,H), v is (1,H) (the bias-free v Linear weight row)."""
    B, H = hidden.shape
    S = encoder_outputs.shape[1]
    f32, bf16 = jnp.float32, jnp.bfloat16

    TB = _pick_block_b(B, S, H) if block_b is None else block_b
    num_tiles = pl.cdiv(B, TB)
    Bp = num_tiles * TB
    pad = Bp - B

    # Hoisted hidden projection + bias: one well-shaped XLA matmul per call
    # (removes a tiny M=TB, K=N=H MXU op from every grid step).
    hproj = hidden.astype(f32) @ wh.astype(f32) + b.reshape(1, H).astype(f32)

    enc_in = encoder_outputs.astype(bf16)            # bf16 in HBM: halve enc DMA
    cov_in = coverage.reshape(B, S).astype(f32)      # lane-dense (B, S)
    if pad:
        hproj = jnp.pad(hproj, ((0, pad), (0, 0)))
        enc_in = jnp.pad(enc_in, ((0, pad), (0, 0), (0, 0)))
        cov_in = jnp.pad(cov_in, ((0, pad), (0, 0)))

    out_shapes = [jax.ShapeDtypeStruct((Bp, H), f32)]               # context
    out_specs = [pl.BlockSpec((TB, H), lambda i: (i, 0))]
    if return_attention:
        out_shapes.append(jax.ShapeDtypeStruct((Bp, S), f32))       # attention
        out_specs.append(pl.BlockSpec((TB, S), lambda i: (i, 0)))
    out_shapes.append(jax.ShapeDtypeStruct((Bp, S), f32))           # coverage
    out_specs.append(pl.BlockSpec((TB, S), lambda i: (i, 0)))

    grid_spec = pltpu.PrefetchScalarGridSpec(
        num_scalar_prefetch=0,
        grid=(num_tiles,),
        in_specs=[
            pl.BlockSpec((TB, H), lambda i: (i, 0)),          # hproj (f32)
            pl.BlockSpec((TB, S, H), lambda i: (i, 0, 0)),    # enc   (bf16)
            pl.BlockSpec((TB, S), lambda i: (i, 0)),          # coverage (f32)
            pl.BlockSpec((H, H), lambda i: (0, 0)),           # We    (bf16)
            pl.BlockSpec((1, H), lambda i: (0, 0)),           # v     (f32)
        ],
        out_specs=out_specs,
    )

    outs = pl.pallas_call(
        _make_attention_kernel(return_attention),
        out_shape=tuple(out_shapes),
        grid_spec=grid_spec,
        compiler_params=pltpu.CompilerParams(
            dimension_semantics=("parallel",)),
    )(hproj, enc_in, cov_in, we.astype(bf16), v.reshape(1, H).astype(f32))

    if return_attention:
        ctx, attn, cov_out = outs
        return ctx[:B], attn[:B], cov_out[:B].reshape(B, S, 1)
    ctx, cov_out = outs
    return ctx[:B], None, cov_out[:B].reshape(B, S, 1)


def attention_reference(hidden, encoder_outputs, coverage, wh, we, b, v):
    # Pure-JAX f32 reference mirroring the PyTorch Attention.forward.
    B, S, H = encoder_outputs.shape
    hidden_rep = jnp.repeat(hidden[:, None, :], S, axis=1)
    energy = jnp.tanh(hidden_rep @ wh + encoder_outputs @ we + b + coverage)
    scores = (energy @ v.T)[..., 0]                         # (B, S)
    attention = jax.nn.softmax(scores, axis=1)
    coverage_out = coverage + attention[..., None]
    context = jnp.einsum("bs,bsh->bh", attention, encoder_outputs)
    return context, attention, coverage_out


# ------------------------------ Decoder forward ------------------------------

def decoder_forward(params, x, hidden, cell, encoder_outputs, coverage,
                    attention_fn=attention_forward):
    """Decoder.forward: x (B,T) int32, hidden/cell (1,B,H),
    encoder_outputs (B,S,H), coverage (B,S,1)."""
    embedded = jnp.take(params["embedding"], x, axis=0)       # (B, T, E)
    T = embedded.shape[1]

    # The decoder discards the attention weights -> don't write them back.
    context, _, coverage = attention_fn(
        hidden[-1], encoder_outputs, coverage,
        params["attn_wh"], params["attn_we"], params["attn_b"], params["attn_v"],
        return_attention=False)

    context_rep = jnp.repeat(context[:, None, :], T, axis=1)  # (B, T, H)
    lstm_in = jnp.concatenate([embedded, context_rep], axis=2)

    # TODO(synk): the LSTM recurrence is inherently sequential; it is left as a
    # lax.scan over timesteps (XLA) rather than a Pallas kernel.
    w_ih, w_hh = params["lstm_w_ih"], params["lstm_w_hh"]
    b_ih, b_hh = params["lstm_b_ih"], params["lstm_b_hh"]

    def step(carry, x_t):
        h, c = carry
        gates = x_t @ w_ih.T + b_ih + h @ w_hh.T + b_hh       # (B, 4H)
        i, f, g, o = jnp.split(gates, 4, axis=-1)             # PyTorch gate order
        i, f, o = jax.nn.sigmoid(i), jax.nn.sigmoid(f), jax.nn.sigmoid(o)
        g = jnp.tanh(g)
        c = f * c + i * g
        h = o * jnp.tanh(c)
        return (h, c), h

    (h_last, c_last), outs = jax.lax.scan(
        step, (hidden[0], cell[0]), jnp.swapaxes(lstm_in, 0, 1))
    outputs = jnp.swapaxes(outs, 0, 1)                        # (B, T, H)

    fc_in = jnp.concatenate([outputs, context_rep], axis=2)   # (B, T, 2H)
    predictions = fc_in @ params["fc_w"].T + params["fc_b"]   # (B, T, V)
    return predictions, h_last[None], c_last[None], coverage


# ----------------------------------- main ------------------------------------

if __name__ == "__main__":
    B, T, S = 64, 6, 8
    V, E, H = 64, 16, 32
    f32 = jnp.float32

    key = jax.random.PRNGKey(0)
    keys = jax.random.split(key, 16)

    # Inputs
    x = jax.random.randint(keys[0], (B, T), 0, V)
    hidden = jax.random.normal(keys[1], (1, B, H), f32)
    cell = jax.random.normal(keys[2], (1, B, H), f32)
    encoder_outputs = jax.random.normal(keys[3], (B, S, H), f32)
    coverage = jax.random.normal(keys[4], (B, S, 1), f32) * 0.1

    # Parameters (PyTorch Linear layout pre-adapted: the attn cat-linear weight
    # W (H, 2H) is split/transposed into wh = W[:, :H].T, we = W[:, H:].T).
    s_attn = 1.0 / jnp.sqrt(2.0 * H)
    s_v = 1.0 / jnp.sqrt(1.0 * H)
    s_lstm = 1.0 / jnp.sqrt(1.0 * H)
    s_fc = 1.0 / jnp.sqrt(2.0 * H)
    emb = jax.random.normal(keys[5], (V, E), f32)
    emb = emb.at[0].set(0.0)                                  # padding_idx=0
    params = dict(
        embedding=emb,
        attn_wh=jax.random.uniform(keys[6], (H, H), f32, -s_attn, s_attn),
        attn_we=jax.random.uniform(keys[7], (H, H), f32, -s_attn, s_attn),
        attn_b=jax.random.uniform(keys[8], (1, H), f32, -s_attn, s_attn),
        attn_v=jax.random.uniform(keys[9], (1, H), f32, -s_v, s_v),
        lstm_w_ih=jax.random.uniform(keys[10], (4 * H, E + H), f32, -s_lstm, s_lstm),
        lstm_w_hh=jax.random.uniform(keys[11], (4 * H, H), f32, -s_lstm, s_lstm),
        lstm_b_ih=jax.random.uniform(keys[12], (4 * H,), f32, -s_lstm, s_lstm),
        lstm_b_hh=jax.random.uniform(keys[13], (4 * H,), f32, -s_lstm, s_lstm),
        fc_w=jax.random.uniform(keys[14], (V, 2 * H), f32, -s_fc, s_fc),
        fc_b=jax.random.uniform(keys[15], (V,), f32, -s_fc, s_fc),
    )

    # --- Attention Pallas kernel vs pure-JAX f32 reference -------------------
    ctx, attn, cov_out = attention_forward(
        hidden[-1], encoder_outputs, coverage,
        params["attn_wh"], params["attn_we"], params["attn_b"], params["attn_v"],
        return_attention=True)
    jax.block_until_ready((ctx, attn, cov_out))

    ctx_r, attn_r, cov_r = attention_reference(
        hidden[-1], encoder_outputs, coverage,
        params["attn_wh"], params["attn_we"], params["attn_b"], params["attn_v"])

    # Tolerances loosened for bf16 encoder_outputs / We on the MXU path.
    assert jnp.allclose(ctx, ctx_r, atol=5e-2, rtol=5e-2)
    assert jnp.allclose(attn, attn_r, atol=3e-2, rtol=3e-2)
    assert jnp.allclose(cov_out, cov_r, atol=3e-2, rtol=3e-2)

    # --- Full Decoder forward (Pallas attention inside, attn output dropped) --
    preds, h_out, c_out, cov_new = decoder_forward(
        params, x, hidden, cell, encoder_outputs, coverage)
    jax.block_until_ready((preds, h_out, c_out, cov_new))

    assert preds.shape == (B, T, V)
    assert h_out.shape == (1, B, H) and c_out.shape == (1, B, H)
    assert cov_new.shape == (B, S, 1)
    assert bool(jnp.all(jnp.isfinite(preds)))
    assert jnp.allclose(cov_new.reshape(B, S), cov_r.reshape(B, S),
                        atol=3e-2, rtol=3e-2)

    print("KERNEL_OK")
</pallas_src>

<mosaic_0001>
module attributes {stable_mosaic.version = 11 : i64} {
  func.func @kernel(%arg0: i32, %arg1: memref<32x32xf32, #tpu.memory_space<vmem>>, %arg2: memref<32x8x32xbf16, #tpu.memory_space<vmem>>, %arg3: memref<32x8xf32, #tpu.memory_space<vmem>>, %arg4: memref<32x32xbf16, #tpu.memory_space<vmem>>, %arg5: memref<1x32xf32, #tpu.memory_space<vmem>>, %arg6: memref<32x32xf32, #tpu.memory_space<vmem>>, %arg7: memref<32x8xf32, #tpu.memory_space<vmem>>, %arg8: memref<32x8xf32, #tpu.memory_space<vmem>>) attributes {dimension_semantics = [#tpu.dimension_semantics<parallel>], iteration_bounds = array<i64: 2>, scalar_prefetch = 0 : i64, scratch_operands = 0 : i64, tpu.core_type = #tpu.core_type<tc>, window_params = [{transform_indices = @transform_0, window_bounds = array<i64: 32, 32>}, {transform_indices = @transform_1, window_bounds = array<i64: 32, 8, 32>}, {transform_indices = @transform_2, window_bounds = array<i64: 32, 8>}, {pipeline_mode = #tpu.pipeline_mode<synchronous>, transform_indices = @transform_3, window_bounds = array<i64: 32, 32>}, {pipeline_mode = #tpu.pipeline_mode<synchronous>, transform_indices = @transform_4, window_bounds = array<i64: 1, 32>}, {transform_indices = @transform_5, window_bounds = array<i64: 32, 32>}, {transform_indices = @transform_6, window_bounds = array<i64: 32, 8>}, {transform_indices = @transform_7, window_bounds = array<i64: 32, 8>}]} {
    %c0 = arith.constant 0 : index
    %c0_0 = arith.constant 0 : index
    %0 = vector.load %arg1[%c0, %c0_0] : memref<32x32xf32, #tpu.memory_space<vmem>>, vector<32x32xf32>
    %c0_1 = arith.constant 0 : index
    %c0_2 = arith.constant 0 : index
    %c0_3 = arith.constant 0 : index
    %1 = vector.load %arg2[%c0_1, %c0_2, %c0_3] : memref<32x8x32xbf16, #tpu.memory_space<vmem>>, vector<32x8x32xbf16>
    %c0_4 = arith.constant 0 : index
    %c0_5 = arith.constant 0 : index
    %2 = vector.load %arg3[%c0_4, %c0_5] : memref<32x8xf32, #tpu.memory_space<vmem>>, vector<32x8xf32>
    %3 = vector.shape_cast %1 : vector<32x8x32xbf16> to vector<256x32xbf16>
    %c0_6 = arith.constant 0 : index
    %c0_7 = arith.constant 0 : index
    %4 = vector.load %arg4[%c0_6, %c0_7] : memref<32x32xbf16, #tpu.memory_space<vmem>>, vector<32x32xbf16>
    %cst = arith.constant dense<0.000000e+00> : vector<256x32xf32>
    %5 = tpu.matmul %3, %4, %cst {dimension_numbers = #tpu.dot_dimension_numbers<[1], [0], [0], [1], [0, 0, 1, 1], [], []>} : vector<256x32xbf16>, vector<32x32xbf16>, vector<256x32xf32> -> vector<256x32xf32>
    %6 = vector.shape_cast %5 : vector<256x32xf32> to vector<32x8x32xf32>
    %7 = vector.shape_cast %0 : vector<32x32xf32> to vector<32x1x32xf32>
    %8 = vector.broadcast %7 : vector<32x1x32xf32> to vector<32x8x32xf32>
    %9 = arith.addf %6, %8 : vector<32x8x32xf32>
    %10 = vector.shape_cast %2 : vector<32x8xf32> to vector<32x8x1xf32>
    %11 = vector.broadcast %10 : vector<32x8x1xf32> to vector<32x8x32xf32>
    %12 = arith.addf %9, %11 : vector<32x8x32xf32>
    %13 = math.tanh %12 : vector<32x8x32xf32>
    %c0_8 = arith.constant 0 : index
    %c0_9 = arith.constant 0 : index
    %14 = vector.load %arg5[%c0_8, %c0_9] : memref<1x32xf32, #tpu.memory_space<vmem>>, vector<1x32xf32>
    %15 = vector.shape_cast %14 : vector<1x32xf32> to vector<1x1x32xf32>
    %16 = vector.broadcast %15 : vector<1x1x32xf32> to vector<32x8x32xf32>
    %17 = arith.mulf %13, %16 : vector<32x8x32xf32>
    %cst_10 = arith.constant dense<0.000000e+00> : vector<32x8xf32>
    %18 = vector.multi_reduction <add>, %17, %cst_10 [2] : vector<32x8x32xf32> to vector<32x8xf32>
    %cst_11 = arith.constant dense<0xFF800000> : vector<32xf32>
    %19 = vector.multi_reduction <maximumf>, %18, %cst_11 [1] : vector<32x8xf32> to vector<32xf32>
    %20 = vector.shape_cast %19 : vector<32xf32> to vector<32x1xf32>
    %21 = vector.broadcast %20 : vector<32x1xf32> to vector<32x8xf32>
    %22 = arith.subf %18, %21 : vector<32x8xf32>
    %23 = math.exp %22 : vector<32x8xf32>
    %cst_12 = arith.constant dense<0.000000e+00> : vector<32xf32>
    %24 = vector.multi_reduction <add>, %23, %cst_12 [1] : vector<32x8xf32> to vector<32xf32>
    %25 = vector.shape_cast %24 : vector<32xf32> to vector<32x1xf32>
    %26 = vector.broadcast %25 : vector<32x1xf32> to vector<32x8xf32>
    %27 = arith.divf %23, %26 : vector<32x8xf32>
    %c0_13 = arith.constant 0 : index
    %c0_14 = arith.constant 0 : index
    %28 = vector.load %arg7[%c0_13, %c0_14] : memref<32x8xf32, #tpu.memory_space<vmem>>, vector<32x8xf32>
    tpu.vector_store %arg7[%c0_13, %c0_14], %27 {strides = array<i32>} : memref<32x8xf32, #tpu.memory_space<vmem>>, vector<32x8xf32>,
    %29 = arith.addf %2, %27 : vector<32x8xf32>
    %c0_15 = arith.constant 0 : index
    %c0_16 = arith.constant 0 : index
    %30 = vector.load %arg8[%c0_15, %c0_16] : memref<32x8xf32, #tpu.memory_space<vmem>>, vector<32x8xf32>
    tpu.vector_store %arg8[%c0_15, %c0_16], %29 {strides = array<i32>} : memref<32x8xf32, #tpu.memory_space<vmem>>, vector<32x8xf32>,
    %31 = vector.shape_cast %27 : vector<32x8xf32> to vector<32x8x1xf32>
    %32 = arith.extf %1 : vector<32x8x32xbf16> to vector<32x8x32xf32>
    %33 = vector.broadcast %31 : vector<32x8x1xf32> to vector<32x8x32xf32>
    %34 = arith.mulf %33, %32 : vector<32x8x32xf32>
    %cst_17 = arith.constant dense<0.000000e+00> : vector<32x32xf32>
    %35 = vector.multi_reduction <add>, %34, %cst_17 [1] : vector<32x8x32xf32> to vector<32x32xf32>
    %c0_18 = arith.constant 0 : index
    %c0_19 = arith.constant 0 : index
    %36 = vector.load %arg6[%c0_18, %c0_19] : memref<32x32xf32, #tpu.memory_space<vmem>>, vector<32x32xf32>
    tpu.vector_store %arg6[%c0_18, %c0_19], %35 {strides = array<i32>} : memref<32x32xf32, #tpu.memory_space<vmem>>, vector<32x32xf32>,
    return
  }
  func.func @transform_0(%arg0: i32) -> (i32, i32) {
    %c0_i32 = arith.constant 0 : i32
    %c0_i32_0 = arith.constant 0 : i32
    return %arg0, %c0_i32 : i32, i32
  }
  func.func @transform_1(%arg0: i32) -> (i32, i32, i32) {
    %c0_i32 = arith.constant 0 : i32
    %c0_i32_0 = arith.constant 0 : i32
    %c0_i32_1 = arith.constant 0 : i32
    return %arg0, %c0_i32, %c0_i32_0 : i32, i32, i32
  }
  func.func @transform_2(%arg0: i32) -> (i32, i32) {
    %c0_i32 = arith.constant 0 : i32
    %c0_i32_0 = arith.constant 0 : i32
    return %arg0, %c0_i32 : i32, i32
  }
  func.func @transform_3(%arg0: i32) -> (i32, i32) {
    %c0_i32 = arith.constant 0 : i32
    %c0_i32_0 = arith.constant 0 : i32
    %c0_i32_1 = arith.constant 0 : i32
    return %c0_i32, %c0_i32_0 : i32, i32
  }
  func.func @transform_4(%arg0: i32) -> (i32, i32) {
    %c0_i32 = arith.constant 0 : i32
    %c0_i32_0 = arith.constant 0 : i32
    %c0_i32_1 = arith.constant 0 : i32
    return %c0_i32, %c0_i32_0 : i32, i32
  }
  func.func @transform_5(%arg0: i32) -> (i32, i32) {
    %c0_i32 = arith.constant 0 : i32
    %c0_i32_0 = arith.constant 0 : i32
    return %arg0, %c0_i32 : i32, i32
  }
  func.func @transform_6(%arg0: i32) -> (i32, i32) {
    %c0_i32 = arith.constant 0 : i32
    %c0_i32_0 = arith.constant 0 : i32
    return %arg0, %c0_i32 : i32, i32
  }
  func.func @transform_7(%arg0: i32) -> (i32, i32) {
    %c0_i32 = arith.constant 0 : i32
    %c0_i32_0 = arith.constant 0 : i32
    return %arg0, %c0_i32 : i32, i32
  }
}

</mosaic_0001>

<bundles_post_ra>
// kernel: tpu_custom_call.1
= control target key start
LH: loop header
LB: loop body
LE: loop exit
PB: predicated region body
PF: predicated region fallthrough
CT: control target
= control target key end

     0   :  { %s3777_s24 = smov 0   ;;  %s5073_s0 = inlined_call_operand.vmem [shape: f32[64,32], index: 0, kind: input, shape index: {}]   ;;  %s5074_s1 = inlined_call_operand.vmem [shape: bf16[64,8,32], index: 1, kind: input, shape index: {}]   ;;  %s5075_s2 = inlined_call_operand.vmem [shape: f32[64,8], index: 2, kind: input, shape index: {}]   ;;  %s5076_s3 = inlined_call_operand.vmem [shape: bf16[32,32], index: 3, kind: input, shape index: {}]   ;;  %s5077_s4 = inlined_call_operand.vmem [shape: f32[1,32], index: 4, kind: input, shape index: {}]   ;;  %s5078_s5 = inlined_call_operand.vmem [shape: f32[64,32], index: 5, kind: output, shape index: {0}]   ;;  %s5079_s6 = inlined_call_operand.vmem [shape: f32[64,8], index: 6, kind: output, shape index: {1}]   ;;  %s5080_s7 = inlined_call_operand.vmem [shape: f32[64,8], index: 7, kind: output, shape index: {2}]  }
   0x1 LB: > { %s3353_s25 = sadd.s32 4294967295, %s3733_s24   ;;  %p3357_p0 = scmp.ge.s32.totalorder %s3733_s24, 1  ;;  %s3733_s24 = sphi %s3777_s24, %s18_s24  }
   0x2   : > { %p265_p1 = scmp.lt.s32.totalorder %s3733_s24, 3 }
   0x4   : > { %p266_p2 = pnand %p3357_p0, %p265_p1 }
   0x6   : > { %269 = sbr.rel (%p266_p2) target bundleno = 1132 (0x46c), region = 40 }
   0xd   : > { %v3477_v0 = vld [vmem:[%s5076_s3] sm:$0xff]   ;;  %s3360_s28 = sshll.u32 %s3353_s25, 5  ;;  %v708_v1 = vlaneseq  ;;  %v3478_v2 = vld [vmem:[%s5076_s3 + $0x8] sm:$0xff]   ;;  %s3358_s8 = sshll.u32 %s3353_s25, 2  ;;  %vm490_vm0 = vcmask 261120   ;;  %vm1677_vm1 = vcmask 1041409  }
   0xe   : > { %p324_p3 = scmp.lt.s32.totalorder %s3360_s28, 63  ;;  %3425 = vmatprep.subr.bf16.mxu0 %v3477_v0  ;;  %3461 = vmatprep.subr.bf16.mxu1 %v3477_v0  ;;  %p318_p4 = scmp.lt.s32.totalorder %s3358_s8, 7  ;;  %vm1679_vm2 = vcmask 1042434   ;;  %vm1681_vm3 = vcmask 1043459   ;;  %vm1683_vm4 = vcmask 1044484   ;;  %vm1685_vm5 = vcmask 1045509  }
   0xf   : > { %v3791_v3 = vshrl.u32 %v708_v1, 7  ;;  %v1548_v4 = vand.u32 127, %v708_v1  ;;  %3426 = vmatpush3.bf16.msra.mxu0 %v3477_v0  ;;  %3463 = vmatpush3.bf16.msra.mxu1 %v3477_v0  ;;  %vm1687_vm6 = vcmask 1046534   ;;  %vm1689_vm7 = vcmask 1047559  }
  0x10   : > { %s5107_s28 = smov (!%p324_p3, %s3360_s28), 63  ;;  %3427 = vmatprep.subr.bf16.mxu0 %v3478_v2  ;;  %3462 = vmatprep.subr.bf16.mxu1 %v3478_v2  ;;  %s5109_s8 = smov (!%p318_p4, %s3358_s8), 7  ;;  %vm1716_vm8 = vcmask 64512  }
  0x11   : > { %v3794_v5 = vsub.s32 %v1548_v4, %v3791_v3  ;;  %s3361_s9 = sshll.u32 %s5107_s28, 2  ;;  %s3807_s13 = sshll.u32 %s5109_s8, 3  ;;  %v3810_v12 = vsub.s32 2, %v3791_v3  ;;  %v3830_v16 = vsub.s32 0, %v3791_v3  ;;  %v3837_v20 = vsub.s32 1, %v3791_v3 }
  0x12   : > { %s3799_s12 = scalar_lea.vmem %s5074_s1, %s3361_s9  ;;  %s3818_s16 = scalar_lea.vmem %s5075_s2, %s3807_s13  ;;  %v3847_v24 = vsub.s32 3, %v3791_v3  ;;  %v3866_v34 = vsub.s32 4, %v3791_v3  ;;  %v3888_v45 = vsub.s32 5, %v3791_v3  ;;  %v3897_v50 = vsub.s32 6, %v3791_v3 }
  0x13   : > { %3428 = vmatpush3.bf16.msra.mxu0 %v3478_v2  ;;  %3464 = vmatpush3.bf16.msra.mxu1 %v3478_v2  ;;  %v358_v6 = vld [vmem:[%s3799_s12] sm:$0xff]   ;;  %v360_v8 = vld [vmem:[%s3799_s12 + $0x8] sm:$0xff]   ;;  %v362_v10 = vld [vmem:[%s3799_s12 + $0x10] sm:$0xff]   ;;  %5093 = vst [vmem:[#allocation2_spill] sm:$0xff] %v3810_v12  ;;  %v3906_v55 = vsub.s32 7, %v3791_v3  ;;  %s3925_s19 = scalar_lea.vmem %s5073_s0, %s3807_s13  ;;  %s4813_s25 = scalar_lea.vmem %s5079_s6, %s3807_s13 }
  0x14   : > { %v374_v7 = vld [vmem:[%s3799_s12 + $0x40] sm:$0xff]   ;;  %v376_v9 = vld [vmem:[%s3799_s12 + $0x48] sm:$0xff]   ;;  %v378_v11 = vld [vmem:[%s3799_s12 + $0x50] sm:$0xff]   ;;  %3429 = vmatprep.mubr.msk.bf16.mxu0 %vm490_vm0, %v358_v6  ;;  %5094 = vst [vmem:[#allocation3_spill] sm:$0xff] %v3847_v24  ;;  %v3735_v2 = vmov 1966171168   ;;  %s4826_s28 = scalar_lea.vmem %s5080_s7, %s3807_s13  ;;  %s4875_s8 = scalar_lea.vmem %s5078_s5, %s3807_s13 }
  0x15   : > { %3445 = vmatprep.mubr.msk.bf16.mxu1 %vm490_vm0, %v374_v7  ;;  %v364_v13 = vld [vmem:[%s3799_s12 + $0x18] sm:$0xff]   ;;  %v3827_v15 = vld [vmem:[%s3818_s16] sm:$0xff]  ;;  %v3840_v21 = vld [vmem:[%s3818_s16 + $0x8] sm:$0xff]  ;;  %5095 = vst [vmem:[#allocation4_spill] sm:$0xff] %v3866_v34  ;;  %v706_v4 = vunpack.c.l.s4 %v3735_v2 }
  0x16   : > { %3430 = vmatmul.mubr.msk.bf16.vlgmr.msra.gmra.mrb[0].mxu0 %vm490_vm0, %v360_v8  ;;  %3446 = vmatmul.mubr.msk.bf16.vlgmr.msra.gmra.mrb[0].mxu1 %vm490_vm0, %v376_v9  ;;  %v380_v14 = vld [vmem:[%s3799_s12 + $0x58] sm:$0xff]   ;;  %v366_v17 = vld [vmem:[%s3799_s12 + $0x20] sm:$0xff]   ;;  %v1109_v19 = vrot.slane %v3827_v15, %v3810_v12  ;;  %v1095_v22 = vrot.slane %v3827_v15, %v3830_v16  ;;  %v1151_v23 = vrot.slane %v3840_v21, %v3830_v16  ;;  %v368_v26 = vld [vmem:[%s3799_s12 + $0x28] sm:$0xff]  }
  0x17   : > { %3433 = vmatprep.mubr.msk.bf16.mxu0 %vm490_vm0, %v362_v10  ;;  %3449 = vmatprep.mubr.msk.bf16.mxu1 %vm490_vm0, %v378_v11  ;;  %v382_v18 = vld [vmem:[%s3799_s12 + $0x60] sm:$0xff]   ;;  %v1102_v25 = vrot.slane %v3827_v15, %v3837_v20  ;;  %v384_v27 = vld [vmem:[%s3799_s12 + $0x68] sm:$0xff]   ;;  %v370_v28 = vld [vmem:[%s3799_s12 + $0x30] sm:$0xff]   ;;  %v1116_v30 = vrot.slane %v3827_v15, %v3847_v24  ;;  %v1158_v31 = vrot.slane %v3840_v21, %v3837_v20  ;;  %v707_v6 = vunpack.c.0.s8 %v706_v4 }
  0x18   : > { %1111 = vbcast.lane.b32.xlu1 %v1109_v19, 256  ;;  %1097 = vbcast.lane.b32.xlu0 %v1095_v22, 256  ;;  %v386_v29 = vld [vmem:[%s3799_s12 + $0x70] sm:$0xff]   ;;  %v1165_v35 = vrot.slane %v3840_v21, %v3810_v12  ;;  %v372_v36 = vld [vmem:[%s3799_s12 + $0x38] sm:$0xff]   ;;  %v1123_v38 = vrot.slane %v3827_v15, %v3866_v34  ;;  %v1172_v41 = vrot.slane %v3840_v21, %v3847_v24 }
  0x19   : > { %v392_v32 = vld [vmem:[%s3818_s16 + $0x10] sm:$0xff]  ;;  %v388_v37 = vld [vmem:[%s3799_s12 + $0x78] sm:$0xff]   ;;  %5096 = vst [vmem:[#allocation5_spill] sm:$0xff] %v3888_v45  ;;  %v1179_v46 = vrot.slane %v3840_v21, %v3866_v34  ;;  %v1130_v47 = vrot.slane %v3827_v15, %v3888_v45  ;;  %5097 = vst [vmem:[#allocation6_spill] sm:$0xff] %v3897_v50  ;;  %v1186_v51 = vrot.slane %v3840_v21, %v3888_v45 }
  0x1a   : > { %v1207_v33 = vrot.slane %v392_v32, %v3830_v16  ;;  %v1214_v39 = vrot.slane %v392_v32, %v3837_v20  ;;  %v1221_v40 = vrot.slane %v392_v32, %v3810_v12  ;;  %v393_v42 = vld [vmem:[%s3818_s16 + $0x18] sm:$0xff]  ;;  %v1228_v49 = vrot.slane %v392_v32, %v3847_v24  ;;  %5098 = vst [vmem:[#allocation7_spill] sm:$0xff] %v3906_v55 }
  0x1b   : > { %v1270_v43 = vrot.slane %v393_v42, %v3837_v20  ;;  %v1263_v44 = vrot.slane %v393_v42, %v3830_v16  ;;  %v1277_v48 = vrot.slane %v393_v42, %v3810_v12  ;;  %v1137_v52 = vrot.slane %v3827_v15, %v3897_v50  ;;  %v357_v7 = vld [vmem:[%s3925_s19 + $0x18] sm:$0xff] }
  0x1c   : > { %1153 = vbcast.lane.b32.xlu1 %v1151_v23, 256  ;;  %1104 = vbcast.lane.b32.xlu0 %v1102_v25, 256  ;;  %v1284_v53 = vrot.slane %v393_v42, %v3847_v24  ;;  %v1235_v54 = vrot.slane %v392_v32, %v3866_v34  ;;  %v1193_v56 = vrot.slane %v3840_v21, %v3897_v50 }
  0x1d   : > { %v1144_v57 = vrot.slane %v3827_v15, %v3906_v55  ;;  %v1291_v58 = vrot.slane %v393_v42, %v3866_v34  ;;  %v1242_v59 = vrot.slane %v392_v32, %v3888_v45  ;;  %v1249_v60 = vrot.slane %v392_v32, %v3897_v50 }
  0x1e   : > { %3434 = vmatmul.mubr.msk.bf16.gmra.mrb[4].mxu0 %vm490_vm0, %v364_v13  ;;  %3450 = vmatmul.mubr.msk.bf16.gmra.mrb[4].mxu1 %vm490_vm0, %v380_v14  ;;  %v1200_v61 = vrot.slane %v3840_v21, %v3906_v55  ;;  %v1256_v62 = vrot.slane %v392_v32, %v3906_v55  ;;  %v1298_v63 = vrot.slane %v393_v42, %v3888_v45 }
  0x1f   : > { %3437 = vmatprep.mubr.msk.bf16.mxu0 %vm490_vm0, %v366_v17  ;;  %3453 = vmatprep.mubr.msk.bf16.mxu1 %vm490_vm0, %v382_v18  ;;  %v1305_v0 = vrot.slane %v393_v42, %v3897_v50  ;;  %v1312_v1 = vrot.slane %v393_v42, %v3906_v55  ;;  %v851_v8 = vcombine.high %v357_v7, %v357_v7 }
  0x20   : > { %1118 = vbcast.lane.b32.xlu1 %v1116_v30, 256  ;;  %1160 = vbcast.lane.b32.xlu0 %v1158_v31, 256  ;;  %v3929_v9 = vsub.s32 %v707_v6, %v3791_v3  ;;  %v356_v30 = vld [vmem:[%s3925_s19 + $0x10] sm:$0xff] }
  0x22   : > { %v3932_v10 = vrot.slane %v851_v8, %v3929_v9  ;;  %v858_v2 = vrot.slane %v357_v7, %v3929_v9 }
  0x24   : > { %1209 = vbcast.lane.b32.xlu1 %v1207_v33, 256  ;;  %1167 = vbcast.lane.b32.xlu0 %v1165_v35, 256  ;;  %v867_v11 = vcombine.high %v3932_v10, %v3932_v10  ;;  %v809_v35 = vrot.slane %v356_v30, %v3929_v9 }
  0x26   : > { %3438 = vmatmul.mubr.msk.bf16.gmra.mrb[8].mxu0 %vm490_vm0, %v368_v26  ;;  %3454 = vmatmul.mubr.msk.bf16.gmra.mrb[8].mxu1 %vm490_vm0, %v384_v27  ;;  %v3937_v13 = vrot.slane %v867_v11, %v3929_v9 }
  0x27   : > { %3441 = vmatprep.mubr.msk.bf16.mxu0 %vm490_vm0, %v370_v28  ;;  %3457 = vmatprep.mubr.msk.bf16.mxu1 %vm490_vm0, %v386_v29  ;;  %v354_v29 = vld [vmem:[%s3925_s19] sm:$0xff] }
  0x28   : > { %1125 = vbcast.lane.b32.xlu1 %v1123_v38, 256  ;;  %1216 = vbcast.lane.b32.xlu0 %v1214_v39, 256  ;;  %v711_v33 = vrot.slane %v354_v29, %v3929_v9  ;;  %v817_v38 = vcombine.high %v809_v35, %v809_v35  ;;  %v802_v39 = vcombine.high %v356_v30, %v356_v30 }
  0x2c   : > { %1223 = vbcast.lane.b32.xlu1 %v1221_v40, 256  ;;  %1174 = vbcast.lane.b32.xlu0 %v1172_v41, 256 }
  0x2e   : > { %3442 = vmatmul.mubr.msk.bf16.gmra.mrb[12].mxu0 %vm490_vm0, %v372_v36  ;;  %3458 = vmatmul.mubr.msk.bf16.gmra.mrb[12].mxu1 %vm490_vm0, %v388_v37  ;;  %v704_v36 = vcombine.high %v354_v29, %v354_v29  ;;  %v719_v37 = vcombine.high %v711_v33, %v711_v33 }
  0x30   : > { %1272 = vbcast.lane.b32.xlu1 %v1270_v43, 256  ;;  %1265 = vbcast.lane.b32.xlu0 %v1263_v44, 256  ;;  %v718_v42 = vrot.slane %v704_v36, %v3929_v9  ;;  %v727_v43 = vrot.slane %v711_v33, %v3929_v9  ;;  %v825_v44 = vrot.slane %v809_v35, %v3929_v9 }
  0x32   : > { %v903_v4 = vrot.slane %v727_v43, %v3830_v16  ;;  %v967_v6 = vrot.slane %v825_v44, %v3830_v16 }
  0x34   : > { %1181 = vbcast.lane.b32.xlu1 %v1179_v46, 256  ;;  %1132 = vbcast.lane.b32.xlu0 %v1130_v47, 256  ;;  %v741_v46 = vrot.slane %v719_v37, %v3929_v9  ;;  %v839_v47 = vrot.slane %v817_v38, %v3929_v9 }
  0x36   : > { %v907_v33 = vrot.slane %v741_v46, %v3830_v16  ;;  %v971_v7 = vrot.slane %v839_v47, %v3830_v16 }
  0x38   : > { %1279 = vbcast.lane.b32.xlu1 %v1277_v48, 256  ;;  %1230 = vbcast.lane.b32.xlu0 %v1228_v49, 256  ;;  %v816_v48 = vrot.slane %v802_v39, %v3929_v9  ;;  %v3984_v49 = vld [vmem:[%s3925_s19 + $0x8] sm:$0xff] }
  0x3a   : > { %v4006_v8 = vrot.slane %v816_v48, %v3929_v9 }
  0x3c   : > { %1188 = vbcast.lane.b32.xlu1 %v1186_v51, 256  ;;  %1139 = vbcast.lane.b32.xlu0 %v1137_v52, 256  ;;  %v720_v51 = vcombine.high %v718_v42, %v718_v42  ;;  %v749_v52 = vcombine.high %v727_v43, %v727_v43 }
  0x40   : > { %1286 = vbcast.lane.b32.xlu1 %v1284_v53, 256  ;;  %1237 = vbcast.lane.b32.xlu0 %v1235_v54, 256  ;;  %v847_v53 = vcombine.high %v825_v44, %v825_v44 }
  0x44   : > { %1195 = vbcast.lane.b32.xlu1 %v1193_v56, 256  ;;  %1146 = vbcast.lane.b32.xlu0 %v1144_v57, 256  ;;  %v3991_v57 = vrot.slane %v718_v42, %v3929_v9 }
  0x46   : > { %v919_v39 = vrot.slane %v3991_v57, %v3830_v16 }
  0x48   : > { %1293 = vbcast.lane.b32.xlu1 %v1291_v58, 256  ;;  %1244 = vbcast.lane.b32.xlu0 %v1242_v59, 256  ;;  %v760_v58 = vrot.slane %v3984_v49, %v3929_v9  ;;  %v751_v59 = vcombine.high %v741_v46, %v741_v46 }
  0x4a   : > { %v4009_v11 = vrot.slane %v760_v58, %v3929_v9  ;;  %v915_v29 = vrot.slane %v751_v59, %v3830_v16 }
  0x4c   : > { %1251 = vbcast.lane.b32.xlu1 %v1249_v60, 256  ;;  %1202 = vbcast.lane.b32.xlu0 %v1200_v61, 256  ;;  %v849_v60 = vcombine.high %v839_v47, %v839_v47  ;;  %v818_v61 = vcombine.high %v816_v48, %v816_v48  ;;  %v4028_v48 = vrot.slane %v858_v2, %v3929_v9 }
  0x4d   : > { %v768_v47 = vcombine.high %v760_v58, %v760_v58  ;;  %v753_v58 = vcombine.high %v3984_v49, %v3984_v49 }
  0x4e   : > { %v979_v30 = vrot.slane %v849_v60, %v3830_v16  ;;  %v4015_v35 = vrot.slane %v818_v61, %v3929_v9  ;;  %v798_v61 = vcombine.high %v4009_v11, %v4009_v11 }
  0x50   : > { %1258 = vbcast.lane.b32.xlu1 %v1256_v62, 256  ;;  %1300 = vbcast.lane.b32.xlu0 %v1298_v63, 256  ;;  %v750_v62 = vcombine.high %v3991_v57, %v3991_v57  ;;  %v3998_v63 = vrot.slane %v720_v51, %v3929_v9  ;;  %v866_v51 = vcombine.high %v858_v2, %v858_v2 }
  0x51   : > { %v848_v57 = vcombine.high %v4006_v8, %v4006_v8  ;;  %v850_v46 = vcombine.high %v4015_v35, %v4015_v35 }
  0x52   : > { %v927_v38 = vrot.slane %v750_v62, %v3830_v16  ;;  %v752_v42 = vcombine.high %v3998_v63, %v3998_v63 }
  0x53   : > { %v991_v49 = vrot.slane %v848_v57, %v3830_v16 }
  0x54   : > { %1307 = vbcast.lane.b32.xlu0 %v1305_v0, 256  ;;  %1314 = vbcast.lane.b32.xlu1 %v1312_v1, 256  ;;  %v911_v0 = vrot.slane %v749_v52, %v3830_v16  ;;  %v975_v1 = vrot.slane %v847_v53, %v3830_v16 }
  0x8a   : > { %v3939_v14 = vpop.permute.xlu1 %1111  ;;  %v3945_v18 = vpop.permute.xlu0 %1097 }
  0x8e   : > { %v3941_v15 = vpop.permute.xlu1 %1153  ;;  %v3949_v19 = vpop.permute.xlu0 %1104 }
  0x92   : > { %v3943_v17 = vpop.permute.xlu1 %1118  ;;  %v3953_v22 = vpop.permute.xlu0 %1160 }
  0x96   : > { %v3947_v3 = vpop.permute.xlu1 %1209  ;;  %v3957_v25 = vpop.permute.xlu0 %1167 }
  0x9a   : > { %v3951_v21 = vpop.permute.xlu1 %1125  ;;  %v3961_v27 = vpop.permute.xlu0 %1216 }
  0x9e   : > { %v3955_v23 = vpop.permute.xlu1 %1223  ;;  %v3967_v31 = vpop.permute.xlu0 %1174 }
  0xa2   : > { %v3959_v26 = vpop.permute.xlu1 %1272  ;;  %v3973_v40 = vpop.permute.xlu0 %1265 }
  0xa6   : > { %v3963_v28 = vpop.permute.xlu1 %1181  ;;  %v3986_v54 = vpop.permute.xlu0 %1132 }
  0xaa   : > { %v3969_v32 = vpop.permute.xlu1 %1279  ;;  %v1231_v36 = vpop.permute.xlu0 %1230 }
  0xae   : > { %v3975_v41 = vpop.permute.xlu1 %1188 }
  0xb2   : > { %v3988_v56 = vpop.permute.xlu1 %1286 }
  0xb6   : > { %v4018_v37 = vpop.permute.xlu1 %1195 }
  0xe9   : > { %v3431_v43 = vpop.f32.mrb[0].mxu0  ;;  %v3447_v44 = vpop.f32.mrb[0].mxu1 }
  0xea   : > { %v1062_v52 = vadd.f32 %v3431_v43, %v911_v0  ;;  %v1078_v53 = vadd.f32 %v3447_v44, %v975_v1  ;;  %v573_v59 = vpop.f32.mrb[1].mxu0  ;;  %v637_v60 = vpop.f32.mrb[1].mxu1 }
  0xeb   : > { %v1060_v62 = vadd.f32 %v903_v4, %v573_v59  ;;  %v1076_v55 = vadd.f32 %v967_v6, %v637_v60  ;;  %v3432_v50 = vpop.f32.mrb[2].mxu0  ;;  %v3448_v45 = vpop.f32.mrb[2].mxu1  ;;  %v896_v4 = vcombine.high %v4028_v48, %v4028_v48  ;;  %v4043_v6 = vrot.slane %v768_v47, %v3929_v9 }
  0xec   : > { %v1318_v0 = vadd.f32 %v3939_v14, %v1062_v52  ;;  %v1334_v1 = vadd.f32 %v3955_v23, %v1078_v53  ;;  %v1063_v2 = vadd.f32 %v3432_v50, %v915_v29  ;;  %v1079_v43 = vadd.f32 %v3448_v45, %v979_v30  ;;  %v576_v44 = vpop.f32.mrb[3].mxu0  ;;  %v640_v34 = vpop.f32.mrb[3].mxu1 }
  0xed   : > { %v1061_v24 = vadd.f32 %v907_v33, %v576_v44  ;;  %v1077_v12 = vadd.f32 %v971_v7, %v640_v34  ;;  %v931_v59 = vrot.slane %v752_v42, %v3830_v16  ;;  %v4048_v14 = vrot.slane %v866_v51, %v3929_v9  ;;  %v1140_v29 = vpop.permute.xlu0 %1139  ;;  %v4055_v30 = vpop.permute.xlu1 %1293 }
  0xee   : > { %3515 = vtanh.f32 %v1318_v0  ;;  %v1316_v45 = vadd.f32 %v3945_v18, %v1060_v62  ;;  %v983_v34 = vrot.slane %v4006_v8, %v3830_v16  ;;  %v767_v50 = vrot.slane %v753_v58, %v3929_v9 }
  0xef   : > { %3517 = vtanh.f32 %v1334_v1  ;;  %v1317_v23 = vadd.f32 %v3949_v19, %v1061_v24  ;;  %v995_v33 = vrot.slane %v850_v46, %v3830_v16  ;;  %v987_v7 = vrot.slane %v4015_v35, %v3830_v16 }
  0xf0   : > { %v943_v42 = vrot.slane %v798_v61, %v3830_v16  ;;  %v1335_v47 = vadd.f32 %v1231_v36, %v1079_v43  ;;  %v1007_v52 = vrot.slane %v896_v4, %v3830_v16  ;;  %v935_v8 = vrot.slane %v4009_v11, %v3830_v16 }
  0xf1   : > { %v3435_v51 = vpop.f32.mrb[4].mxu0  ;;  %v3451_v18 = vpop.f32.mrb[4].mxu1  ;;  %v800_v24 = vcombine.high %v4043_v6, %v4043_v6  ;;  %v1332_v19 = vadd.f32 %v3947_v3, %v1076_v55  ;;  %v898_v35 = vcombine.high %v4048_v14, %v4048_v14  ;;  %3519 = vtanh.f32 %v1316_v45 }
  0xf2   : > { %v1066_v53 = vadd.f32 %v3435_v51, %v927_v38  ;;  %v589_v46 = vpop.f32.mrb[5].mxu0  ;;  %v1082_v60 = vadd.f32 %v3451_v18, %v991_v49  ;;  %v653_v57 = vpop.f32.mrb[5].mxu1  ;;  %v4070_v0 = vrot.slane %v767_v50, %v3929_v9  ;;  %v1319_v11 = vadd.f32 %v3943_v17, %v1063_v2  ;;  %v4088_v17 = vld [vmem:[%s5077_s4] ss:$0 sm:$0xff] }
  0xf3   : > { %v1064_v36 = vadd.f32 %v919_v39, %v589_v46  ;;  %v3436_v61 = vpop.f32.mrb[6].mxu0  ;;  %v1080_v62 = vadd.f32 %v983_v34, %v653_v57  ;;  %v3452_v58 = vpop.f32.mrb[6].mxu1  ;;  %3521 = vtanh.f32 %v1317_v23  ;;  %v1333_v43 = vadd.f32 %v3961_v27, %v1077_v12 }
  0xf4   : > { %v4073_v1 = vadd.f32 %v3436_v61, %v931_v59  ;;  %v592_v55 = vpop.f32.mrb[7].mxu0  ;;  %v4075_v3 = vadd.f32 %v3452_v58, %v995_v33  ;;  %v656_v38 = vpop.f32.mrb[7].mxu1  ;;  %3523 = vtanh.f32 %v1335_v47  ;;  %v5099_v39 = vrot.slane %v3998_v63, %v3830_v16 }
  0xf5   : > { %v769_v4 = vcombine.high %v767_v50, %v767_v50  ;;  %3525 = vtanh.f32 %v1332_v19  ;;  %v1322_v49 = vadd.f32 %v1140_v29, %v1066_v53  ;;  %v4083_v45 = vadd.f32 %v987_v7, %v656_v38  ;;  %v1238_v50 = vpop.permute.xlu0 %1237  ;;  %v1252_v23 = vpop.permute.xlu1 %1251 }
  0xf6   : > { %v4081_v44 = vadd.f32 %v5099_v39, %v592_v55  ;;  %v4092_v2 = vrot.slane %v3932_v10, %v3929_v9  ;;  %v999_v12 = vrot.slane %v4028_v48, %v3830_v16  ;;  %v947_v27 = vrot.slane %v800_v24, %v3830_v16 }
  0xf7   : > { %v939_v63 = vrot.slane %v4043_v6, %v3830_v16  ;;  %v1003_v59 = vrot.slane %v4048_v14, %v3830_v16  ;;  %3527 = vtanh.f32 %v1319_v11  ;;  %v1011_v29 = vrot.slane %v898_v35, %v3830_v16 }
  0xf8   : > { %v3516_v34 = vpop.eup %3515  ;;  %v799_v10 = vcombine.high %v4070_v0, %v4070_v0  ;;  %v897_v48 = vcombine.high %v4092_v2, %v4092_v2  ;;  %3529 = vtanh.f32 %v1333_v43  ;;  %v1336_v7 = vadd.f32 %v1238_v50, %v1080_v62 }
  0xf9   : > { %v3518_v33 = vpop.eup %3517  ;;  %v3439_v47 = vpop.f32.mrb[8].mxu0  ;;  %v1389_v51 = vmul.f32 %v3516_v34, %v4088_v17  ;;  %v4108_v14 = vrot.slane %v769_v4, %v3929_v9  ;;  %3531 = vtanh.f32 %v1322_v49  ;;  %v1338_v18 = vadd.f32 %v1252_v23, %v1082_v60 }
  0xfa   : > { %v3455_v6 = vpop.f32.mrb[8].mxu1  ;;  %v4110_v24 = vadd.f32 %v3439_v47, %v943_v42  ;;  %v605_v53 = vpop.f32.mrb[9].mxu0  ;;  %v1405_v11 = vmul.f32 %v3518_v33, %v4088_v17  ;;  %v1320_v38 = vadd.f32 %v3951_v21, %v1064_v36  ;;  %v1023_v34 = vrot.slane %v897_v48, %v3830_v16 }
  0xfb   : > { %v4112_v19 = vadd.f32 %v3455_v6, %v1007_v52  ;;  %v669_v46 = vpop.f32.mrb[9].mxu1  ;;  %v4114_v57 = vadd.f32 %v935_v8, %v605_v53  ;;  %v3440_v61 = vpop.f32.mrb[10].mxu0  ;;  %v1425_v58 = vsel %vm490_vm0, %v1389_v51, 0.0  ;;  %v801_v52 = vcombine.high %v4108_v14, %v4108_v14 }
  0xfc   : > { %v4116_v35 = vadd.f32 %v999_v12, %v669_v46  ;;  %v3456_v62 = vpop.f32.mrb[10].mxu1  ;;  %v4120_v9 = vadd.f32 %v3440_v61, %v947_v27  ;;  %v608_v42 = vpop.f32.mrb[11].mxu0  ;;  %1426 = vadd.xlane.f32.xlu0 %v1425_v58  ;;  %3533 = vtanh.f32 %v1338_v18  ;;  %v959_v27 = vrot.slane %v799_v10, %v3830_v16 }
  0xfd   : > { %v4122_v55 = vadd.f32 %v3456_v62, %v1011_v29  ;;  %v672_v60 = vpop.f32.mrb[11].mxu1  ;;  %v3520_v8 = vpop.eup %3519  ;;  %v4127_v43 = vadd.f32 %v939_v63, %v608_v42  ;;  %3535 = vtanh.f32 %v1336_v7  ;;  %v1473_v23 = vsel %vm490_vm0, %v1405_v11, 0.0 }
  0xfe   : > { %v4129_v39 = vadd.f32 %v1003_v59, %v672_v60  ;;  %v3522_v4 = vpop.eup %3521  ;;  %v1147_v49 = vpop.permute.xlu0 %1146  ;;  %v951_v29 = vrot.slane %v4070_v0, %v3830_v16  ;;  %v1015_v21 = vrot.slane %v4092_v2, %v3830_v16  ;;  %v963_v59 = vrot.slane %v801_v52, %v3830_v16 }
  0xff   : > { %v1259_v12 = vpop.permute.xlu1 %1258  ;;  %v3524_v50 = vpop.eup %3523  ;;  %v955_v10 = vrot.slane %v4108_v14, %v3830_v16  ;;  %v1387_v48 = vmul.f32 %v3520_v8, %v4088_v17  ;;  %3537 = vtanh.f32 %v1320_v38  ;;  %v1323_v33 = vadd.f32 %v1147_v49, %v4073_v1 }
 0x100   : > { %v3526_v36 = vpop.eup %3525  ;;  %v1406_v63 = vmul.f32 %v3524_v50, %v4088_v17  ;;  %1474 = vadd.xlane.f32.xlu0 %v1473_v23  ;;  %v1339_v7 = vadd.f32 %v1259_v12, %v4075_v3  ;;  %v899_v2 = vcombine.high %v3937_v13, %v3937_v13  ;;  %v1388_v61 = vmul.f32 %v3522_v4, %v4088_v17 }
 0x101   : > { %v3443_v0 = vpop.f32.mrb[12].mxu0  ;;  %v3459_v47 = vpop.f32.mrb[12].mxu1  ;;  %v1419_v11 = vsel %vm490_vm0, %v1387_v48, 0.0  ;;  %v1403_v42 = vmul.f32 %v3526_v36, %v4088_v17  ;;  %v1321_v4 = vadd.f32 %v3986_v54, %v4081_v44  ;;  %3539 = vtanh.f32 %v1323_v33 }
 0x102   : > { %v3528_v6 = vpop.eup %3527  ;;  %v1476_v51 = vsel %vm490_vm0, %v1406_v63, 0.0  ;;  %v4148_v18 = vadd.f32 %v3443_v0, %v959_v27  ;;  %v4150_v53 = vadd.f32 %v3459_v47, %v1023_v34  ;;  %v621_v14 = vpop.f32.mrb[13].mxu0  ;;  %v1342_v27 = vadd.f32 %v3969_v32, %v4112_v19 }
 0x103   : > { %v685_v46 = vpop.f32.mrb[13].mxu1  ;;  %v3530_v62 = vpop.eup %3529  ;;  %1477 = vadd.xlane.f32.xlu1 %v1476_v51  ;;  %v4153_v1 = vadd.f32 %v951_v29, %v621_v14  ;;  %3541 = vtanh.f32 %v1339_v7  ;;  %v1422_v50 = vsel %vm490_vm0, %v1388_v61, 0.0  ;;  %v1467_v29 = vsel %vm490_vm0, %v1403_v42, 0.0 }
 0x104   : > { %v4155_v3 = vadd.f32 %v1015_v21, %v685_v46  ;;  %v3444_v58 = vpop.f32.mrb[14].mxu0  ;;  %v3460_v60 = vpop.f32.mrb[14].mxu1  ;;  %1420 = vadd.xlane.f32.xlu0 %v1419_v11  ;;  %v1404_v23 = vmul.f32 %v3530_v62, %v4088_v17  ;;  %v1390_v21 = vmul.f32 %v3528_v6, %v4088_v17  ;;  %v1027_v36 = vrot.slane %v899_v2, %v3830_v16 }
 0x105   : > { %v3532_v52 = vpop.eup %3531  ;;  %v4159_v8 = vadd.f32 %v3444_v58, %v963_v59  ;;  %v624_v38 = vpop.f32.mrb[15].mxu0  ;;  %v1019_v32 = vrot.slane %v3937_v13, %v3830_v16  ;;  %3543 = vtanh.f32 %v1321_v4  ;;  %v1324_v59 = vadd.f32 %v3941_v15, %v4114_v57 }
 0x106   : > { %v688_v49 = vpop.f32.mrb[15].mxu1  ;;  %v4163_v12 = vadd.f32 %v955_v10, %v624_v38  ;;  %v1245_v34 = vpop.permute.xlu0 %1244  ;;  %v1393_v44 = vmul.f32 %v3532_v52, %v4088_v17  ;;  %3545 = vtanh.f32 %v1342_v27  ;;  %v1470_v10 = vsel %vm490_vm0, %v1404_v23, 0.0 }
 0x107   : > { %1423 = vadd.xlane.f32.xlu1 %v1422_v50  ;;  %v3534_v54 = vpop.eup %3533  ;;  %v1337_v63 = vadd.f32 %v1245_v34, %v4083_v45  ;;  %v1428_v33 = vsel %vm490_vm0, %v1390_v21, 0.0  ;;  %v1091_v0 = vadd.f32 %v3460_v60, %v1027_v36  ;;  %v1326_v13 = vadd.f32 %v3957_v25, %v4110_v24  ;;  %v1315_v57 = vpop.permute.xlu1 %1314 }
 0x108   : > { %1468 = vadd.xlane.f32.xlu0 %v1467_v29  ;;  %v3536_v19 = vpop.eup %3535  ;;  %v1409_v7 = vmul.f32 %v3534_v54, %v4088_v17  ;;  %v1437_v47 = vsel %vm490_vm0, %v1393_v44, 0.0  ;;  %v4185_v2 = vadd.f32 %v1019_v32, %v688_v49  ;;  %v1343_v15 = vadd.f32 %v3988_v56, %v4122_v55 }
 0x109   : > { %v3538_v48 = vpop.eup %3537  ;;  %v1407_v45 = vmul.f32 %v3536_v19, %v4088_v17  ;;  %3547 = vtanh.f32 %v1337_v63  ;;  %v1347_v46 = vadd.f32 %v1315_v57, %v1091_v0  ;;  %v1340_v61 = vadd.f32 %v3973_v40, %v4116_v35 }
 0x10a   : > { %3549 = vtanh.f32 %v1324_v59  ;;  %v1485_v51 = vsel %vm490_vm0, %v1409_v7, 0.0  ;;  %v1391_v14 = vmul.f32 %v3538_v48, %v4088_v17  ;;  %v1341_v56 = vadd.f32 %v3959_v26, %v4129_v39  ;;  %v1203_v60 = vpop.permute.xlu0 %1202 }
 0x10b   : > { %1471 = vadd.xlane.f32.xlu1 %v1470_v10  ;;  %v3540_v6 = vpop.eup %3539  ;;  %3551 = vtanh.f32 %v1326_v13  ;;  %v1479_v24 = vsel %vm490_vm0, %v1407_v45, 0.0  ;;  %v1327_v40 = vadd.f32 %v3967_v31, %v4120_v9  ;;  %v1330_v26 = vadd.f32 %v4018_v37, %v4148_v18 }
 0x10c   : > { %1429 = vadd.xlane.f32.xlu0 %v1428_v33  ;;  %3553 = vtanh.f32 %v1343_v15  ;;  %v1394_v55 = vmul.f32 %v3540_v6, %v4088_v17  ;;  %v1431_v58 = vsel %vm490_vm0, %v1391_v14, 0.0  ;;  %v1325_v31 = vadd.f32 %v3953_v22, %v4127_v43 }
 0x10d   : > { %v3542_v25 = vpop.eup %3541  ;;  %3555 = vtanh.f32 %v1347_v46  ;;  %v1328_v37 = vadd.f32 %v3963_v28, %v4153_v1  ;;  %v1331_v29 = vadd.f32 %v1203_v60, %v4159_v8  ;;  %v1344_v28 = vadd.f32 %v4055_v30, %v4155_v3 }
 0x10e   : > { %v1410_v11 = vmul.f32 %v3542_v25, %v4088_v17  ;;  %3557 = vtanh.f32 %v1340_v61  ;;  %v1440_v35 = vsel %vm490_vm0, %v1394_v55, 0.0  ;;  %v1301_v34 = vpop.permute.xlu0 %1300  ;;  %v1329_v30 = vadd.f32 %v3975_v41, %v4163_v12 }
 0x10f   : > { %1438 = vadd.xlane.f32.xlu1 %v1437_v47  ;;  %v3544_v62 = vpop.eup %3543  ;;  %3559 = vtanh.f32 %v1341_v56  ;;  %v1345_v44 = vadd.f32 %v1301_v34, %v4185_v2 }
 0x110   : > { %1486 = vadd.xlane.f32.xlu0 %v1485_v51  ;;  %v3546_v42 = vpop.eup %3545  ;;  %v1392_v39 = vmul.f32 %v3544_v62, %v4088_v17  ;;  %v1488_v38 = vsel %vm490_vm0, %v1410_v11, 0.0  ;;  %3561 = vtanh.f32 %v1327_v40 }
 0x111   : > { %v1413_v49 = vmul.f32 %v3546_v42, %v4088_v17  ;;  %3563 = vtanh.f32 %v1330_v26 }
 0x112   : > { %v1434_v18 = vsel %vm490_vm0, %v1392_v39, 0.0  ;;  %3565 = vtanh.f32 %v1325_v31  ;;  %v1308_v63 = vpop.permute.xlu0 %1307 }
 0x113   : > { %1480 = vadd.xlane.f32.xlu1 %v1479_v24  ;;  %v3548_v52 = vpop.eup %3547  ;;  %v1497_v23 = vsel %vm490_vm0, %v1413_v49, 0.0  ;;  %3567 = vtanh.f32 %v1328_v37  ;;  %v1346_v33 = vadd.f32 %v1308_v63, %v4150_v53 }
 0x114   : > { %1432 = vadd.xlane.f32.xlu0 %v1431_v58  ;;  %v3550_v4 = vpop.eup %3549  ;;  %v1408_v27 = vmul.f32 %v3548_v52, %v4088_v17  ;;  %3569 = vtanh.f32 %v1331_v29 }
 0x115   : > { %v3552_v9 = vpop.eup %3551  ;;  %v1395_v21 = vmul.f32 %v3550_v4, %v4088_v17  ;;  %3571 = vtanh.f32 %v1344_v28 }
 0x116   : > { %v3554_v50 = vpop.eup %3553  ;;  %v1482_v43 = vsel %vm490_vm0, %v1408_v27, 0.0  ;;  %v1397_v1 = vmul.f32 %v3552_v9, %v4088_v17  ;;  %3573 = vtanh.f32 %v1345_v44 }
 0x117   : > { %1441 = vadd.xlane.f32.xlu1 %v1440_v35  ;;  %v3556_v36 = vpop.eup %3555  ;;  %v1443_v8 = vsel %vm490_vm0, %v1395_v21, 0.0  ;;  %v1414_v32 = vmul.f32 %v3554_v50, %v4088_v17  ;;  %3575 = vtanh.f32 %v1329_v30 }
 0x118   : > { %1489 = vadd.xlane.f32.xlu0 %v1488_v38  ;;  %v4217_v22 = vmul.f32 %v3556_v36, %v4088_v17  ;;  %v3558_v54 = vpop.eup %3557  ;;  %v1449_v3 = vsel %vm490_vm0, %v1397_v1, 0.0  ;;  %3577 = vtanh.f32 %v1346_v33 }
 0x119   : > { %v3560_v19 = vpop.eup %3559  ;;  %v1411_v59 = vmul.f32 %v3558_v54, %v4088_v17  ;;  %v1500_v48 = vsel %vm490_vm0, %v1414_v32, 0.0 }
 0x11a   : > { %v3562_v10 = vpop.eup %3561  ;;  %v1412_v7 = vmul.f32 %v3560_v19, %v4088_v17  ;;  %v1512_v52 = vsel %vm490_vm0, %v4217_v22, 0.0 }
 0x11b   : > { %1435 = vadd.xlane.f32.xlu1 %v1434_v18  ;;  %v3564_v0 = vpop.eup %3563  ;;  %v1491_v13 = vsel %vm490_vm0, %v1411_v59, 0.0  ;;  %v1398_v41 = vmul.f32 %v3562_v10, %v4088_v17 }
 0x11c   : > { %1498 = vadd.xlane.f32.xlu0 %v1497_v23  ;;  %v3566_v12 = vpop.eup %3565  ;;  %v1494_v47 = vsel %vm490_vm0, %v1412_v7, 0.0  ;;  %v1401_v45 = vmul.f32 %v3564_v0, %v4088_v17 }
 0x11d   : > { %v3568_v2 = vpop.eup %3567  ;;  %v1452_v53 = vsel %vm490_vm0, %v1398_v41, 0.0  ;;  %v1396_v57 = vmul.f32 %v3566_v12, %v4088_v17 }
 0x11e   : > { %v3570_v15 = vpop.eup %3569  ;;  %v1461_v6 = vsel %vm490_vm0, %v1401_v45, 0.0  ;;  %v1399_v51 = vmul.f32 %v3568_v2, %v4088_v17 }
 0x11f   : > { %1483 = vadd.xlane.f32.xlu1 %v1482_v43  ;;  %v3572_v14 = vpop.eup %3571  ;;  %v1402_v25 = vmul.f32 %v3570_v15, %v4088_v17  ;;  %v1446_v46 = vsel %vm490_vm0, %v1396_v57, 0.0 }
 0x120   : > { %1444 = vadd.xlane.f32.xlu0 %v1443_v8  ;;  %v3574_v24 = vpop.eup %3573  ;;  %v1455_v61 = vsel %vm490_vm0, %v1399_v51, 0.0  ;;  %v1415_v56 = vmul.f32 %v3572_v14, %v4088_v17 }
 0x121   : > { %v3576_v55 = vpop.eup %3575  ;;  %v1464_v62 = vsel %vm490_vm0, %v1402_v25, 0.0  ;;  %v1416_v58 = vmul.f32 %v3574_v24, %v4088_v17 }
 0x122   : > { %v3578_v11 = vpop.eup %3577  ;;  %v1503_v42 = vsel %vm490_vm0, %v1415_v56, 0.0  ;;  %v1400_v60 = vmul.f32 %v3576_v55, %v4088_v17 }
 0x123   : > { %1450 = vadd.xlane.f32.xlu1 %v1449_v3  ;;  %v1506_v40 = vsel %vm490_vm0, %v1416_v58, 0.0  ;;  %v1417_v26 = vmul.f32 %v3578_v11, %v4088_v17 }
 0x124   : > { %1501 = vadd.xlane.f32.xlu0 %v1500_v48  ;;  %v1458_v35 = vsel %vm490_vm0, %v1400_v60, 0.0 }
 0x125   : > { %v1509_v39 = vsel %vm490_vm0, %v1417_v26, 0.0 }
 0x127   : > { %1492 = vadd.xlane.f32.xlu1 %v1491_v13 }
 0x128   : > { %1495 = vadd.xlane.f32.xlu0 %v1494_v47 }
 0x12b   : > { %1453 = vadd.xlane.f32.xlu1 %v1452_v53 }
 0x12c   : > { %1462 = vadd.xlane.f32.xlu0 %v1461_v6 }
 0x12f   : > { %1447 = vadd.xlane.f32.xlu1 %v1446_v46 }
 0x130   : > { %1456 = vadd.xlane.f32.xlu0 %v1455_v61 }
 0x133   : > { %1465 = vadd.xlane.f32.xlu1 %v1464_v62 }
 0x134   : > { %1504 = vadd.xlane.f32.xlu0 %v1503_v42 }
 0x137   : > { %1507 = vadd.xlane.f32.xlu1 %v1506_v40 }
 0x138   : > { %1459 = vadd.xlane.f32.xlu0 %v1458_v35 }
 0x13b   : > { %1510 = vadd.xlane.f32.xlu1 %v1509_v39 }
 0x13c   : > { %1513 = vadd.xlane.f32.xlu0 %v1512_v52 }
 0x189   : > { %v4255_v38 = vpop.xlane.xlu0 %1426 }
 0x18a   : > { %v1560_v43 = vrot.slane %v4255_v38, %v3794_v5 }
 0x18d   : > { %v4257_v49 = vpop.xlane.xlu0 %1474 }
 0x18e   : > { %v1624_v30 = vrot.slane %v4257_v49, %v3794_v5 }
 0x190   : > { %v4259_v4 = vpop.xlane.xlu1 %1477 }
 0x191   : > { %v4261_v31 = vpop.xlane.xlu0 %1420  ;;  %v1628_v13 = vrot.slane %v4259_v4, %v3794_v5 }
 0x192   : > { %v1552_v50 = vrot.slane %v4261_v31, %v3794_v5 }
 0x194   : > { %v4263_v17 = vpop.xlane.xlu1 %1423 }
 0x195   : > { %v4265_v9 = vpop.xlane.xlu0 %1468  ;;  %v1556_v29 = vrot.slane %v4263_v17, %v3794_v5 }
 0x196   : > { %v1616_v22 = vrot.slane %v4265_v9, %v3794_v5 }
 0x197   : > { %v1678_v36 = vsel %vm1677_vm1, %v1556_v29, %v1552_v50 }
 0x198   : > { %v4267_v37 = vpop.xlane.xlu1 %1471  ;;  %v1680_v32 = vsel %vm1679_vm2, %v1560_v43, %v1678_v36 }
 0x199   : > { %v4269_v18 = vpop.xlane.xlu0 %1429  ;;  %v1620_v8 = vrot.slane %v4267_v37, %v3794_v5 }
 0x19a   : > { %v1564_v28 = vrot.slane %v4269_v18, %v3794_v5 }
 0x19b   : > { %v1698_v19 = vsel %vm1677_vm1, %v1620_v8, %v1616_v22 }
 0x19c   : > { %v4271_v27 = vpop.xlane.xlu1 %1438  ;;  %v1682_v63 = vsel %vm1681_vm3, %v1564_v28, %v1680_v32  ;;  %v1699_v33 = vsel %vm1679_vm2, %v1624_v30, %v1698_v19 }
 0x19d   : > { %v4273_v34 = vpop.xlane.xlu0 %1486  ;;  %v1576_v7 = vrot.slane %v4271_v27, %v3794_v5  ;;  %v1700_v2 = vsel %vm1681_vm3, %v1628_v13, %v1699_v33 }
 0x19e   : > { %v1640_v51 = vrot.slane %v4273_v34, %v3794_v5 }
 0x1a0   : > { %v4277_v23 = vpop.xlane.xlu1 %1480 }
 0x1a1   : > { %v4281_v21 = vpop.xlane.xlu0 %1432  ;;  %v1632_v0 = vrot.slane %v4277_v23, %v3794_v5 }
 0x1a2   : > { %v1568_v54 = vrot.slane %v4281_v21, %v3794_v5 }
 0x1a3   : > { %v1701_v6 = vsel %vm1683_vm4, %v1632_v0, %v1700_v2 }
 0x1a4   : > { %v4290_v1 = vpop.xlane.xlu1 %1441  ;;  %v1684_v3 = vsel %vm1683_vm4, %v1568_v54, %v1682_v63 }
 0x1a5   : > { %v4296_v44 = vpop.xlane.xlu0 %1489  ;;  %v1580_v41 = vrot.slane %v4290_v1, %v3794_v5 }
 0x1a6   : > { %v1644_v25 = vrot.slane %v4296_v44, %v3794_v5 }
 0x1a8   : > { %v4304_v59 = vpop.xlane.xlu1 %1435 }
 0x1a9   : > { %v1572_v10 = vrot.slane %v4304_v59, %v3794_v5  ;;  %v4308_v48 = vpop.xlane.xlu0 %1498 }
 0x1aa   : > { %v1656_v36 = vrot.slane %v4308_v48, %v3794_v5 }
 0x1ab   : > { %v1686_v12 = vsel %vm1685_vm5, %v1572_v10, %v1684_v3 }
 0x1ac   : > { %v4320_v47 = vpop.xlane.xlu1 %1483  ;;  %v1688_v45 = vsel %vm1687_vm6, %v1576_v7, %v1686_v12 }
 0x1ad   : > { %v1636_v15 = vrot.slane %v4320_v47, %v3794_v5  ;;  %v1690_v53 = vsel %vm1689_vm7, %v1580_v41, %v1688_v45  ;;  %v4327_v57 = vpop.xlane.xlu0 %1444 }
 0x1ae   : > { %v1717_v14 = vsel %vm1716_vm8, %v1690_v53, -inf  ;;  %v1584_v50 = vrot.slane %v4327_v57, %v3794_v5 }
 0x1af   : > { %1718 = vmax.xlane.f32.xlu1 %v1717_v14  ;;  %v1702_v24 = vsel %vm1685_vm5, %v1636_v15, %v1701_v6 }
 0x1b0   : > { %v4336_v46 = vpop.xlane.xlu1 %1450  ;;  %v1703_v61 = vsel %vm1687_vm6, %v1640_v51, %v1702_v24 }
 0x1b1   : > { %v1704_v56 = vsel %vm1689_vm7, %v1644_v25, %v1703_v61  ;;  %v4340_v55 = vpop.xlane.xlu0 %1501  ;;  %v1592_v43 = vrot.slane %v4336_v46, %v3794_v5 }
 0x1b2   : > { %v1723_v62 = vsel %vm1716_vm8, %v1704_v56, -inf  ;;  %v1660_v32 = vrot.slane %v4340_v55, %v3794_v5 }
 0x1b3   : > { %1724 = vmax.xlane.f32.xlu1 %v1723_v62 }
 0x1b4   : > { %v4343_v58 = vpop.xlane.xlu1 %1492 }
 0x1b5   : > { %v4345_v11 = vpop.xlane.xlu0 %1495  ;;  %v1648_v26 = vrot.slane %v4343_v58, %v3794_v5 }
 0x1b6   : > { %v1652_v40 = vrot.slane %v4345_v11, %v3794_v5 }
 0x1b8   : > { %v4347_v42 = vpop.xlane.xlu1 %1453  ;;  %v1705_v29 = vsel %vm1677_vm1, %v1652_v40, %v1648_v26 }
 0x1b9   : > { %v4349_v60 = vpop.xlane.xlu0 %1462  ;;  %v1706_v54 = vsel %vm1679_vm2, %v1656_v36, %v1705_v29  ;;  %v1596_v3 = vrot.slane %v4347_v42, %v3794_v5 }
 0x1ba   : > { %v1707_v33 = vsel %vm1681_vm3, %v1660_v32, %v1706_v54  ;;  %v1608_v45 = vrot.slane %v4349_v60, %v3794_v5  ;;  %v5101_v32 = vld [vmem:[#allocation3_spill] sm:$0xff] }
 0x1bc   : > { %v4355_v35 = vpop.xlane.xlu1 %1447 }
 0x1bd   : > { %v1588_v39 = vrot.slane %v4355_v35, %v3794_v5  ;;  %v4359_v52 = vpop.xlane.xlu0 %1456 }
 0x1be   : > { %v1600_v30 = vrot.slane %v4359_v52, %v3794_v5 }
 0x1bf   : > { %v1691_v22 = vsel %vm1677_vm1, %v1588_v39, %v1584_v50  ;;  %v3736_v50 = vmov 0  }
 0x1c0   : > { %v4367_v28 = vpop.xlane.xlu1 %1465  ;;  %v1692_v63 = vsel %vm1679_vm2, %v1592_v43, %v1691_v22  ;;  %3476 = vset.pattern.permute.xlu0 %v3736_v50  ;;  %3475 = vset.pattern.permute.xlu1 %v3736_v50  ;;  %v5100_v43 = vld [vmem:[#allocation2_spill] sm:$0xff] }
 0x1c1   : > { %v4372_v8 = vpop.xlane.xlu0 %1504  ;;  %v1693_v41 = vsel %vm1681_vm3, %v1596_v3, %v1692_v63  ;;  %v1612_v15 = vrot.slane %v4367_v28, %v3794_v5 }
 0x1c2   : > { %v1664_v19 = vrot.slane %v4372_v8, %v3794_v5  ;;  %v1694_v2 = vsel %vm1683_vm4, %v1600_v30, %v1693_v41 }
 0x1c4   : > { %v4383_v10 = vpop.xlane.xlu1 %1507  ;;  %v1708_v0 = vsel %vm1683_vm4, %v1664_v19, %v1707_v33 }
 0x1c5   : > { %v1668_v7 = vrot.slane %v4383_v10, %v3794_v5  ;;  %v4389_v13 = vpop.xlane.xlu0 %1459 }
 0x1c6   : > { %v1604_v12 = vrot.slane %v4389_v13, %v3794_v5 }
 0x1c7   : > { %v1709_v51 = vsel %vm1685_vm5, %v1668_v7, %v1708_v0 }
 0x1c8   : > { %v4399_v53 = vpop.xlane.xlu1 %1510  ;;  %v1695_v6 = vsel %vm1685_vm5, %v1604_v12, %v1694_v2  ;;  %v5102_v12 = vld [vmem:[#allocation4_spill] sm:$0xff] }
 0x1c9   : > { %v1672_v14 = vrot.slane %v4399_v53, %v3794_v5  ;;  %v4405_v25 = vpop.xlane.xlu0 %1513  ;;  %v1696_v24 = vsel %vm1687_vm6, %v1608_v45, %v1695_v6 }
 0x1ca   : > { %v1676_v61 = vrot.slane %v4405_v25, %v3794_v5  ;;  %v1697_v56 = vsel %vm1689_vm7, %v1612_v15, %v1696_v24 }
 0x1cb   : > { %v1720_v62 = vsel %vm1716_vm8, %v1697_v56, -inf  ;;  %v1710_v40 = vsel %vm1687_vm6, %v1672_v14, %v1709_v51  ;;  %v5104_v56 = vld [vmem:[#allocation6_spill] sm:$0xff] }
 0x1cc   : > { %1721 = vmax.xlane.f32.xlu0 %v1720_v62  ;;  %v1711_v26 = vsel %vm1689_vm7, %v1676_v61, %v1710_v40 }
 0x1cd   : > { %v1726_v39 = vsel %vm1716_vm8, %v1711_v26, -inf }
 0x1d0   : > { %1727 = vmax.xlane.f32.xlu0 %v1726_v39 }
 0x23c   : > { %v1719_v29 = vpop.xlane.xlu1 %1718 }
 0x23d   : > { %v1736_v36 = vrot.slane %v1719_v29, %v3830_v16  ;;  %v1740_v22 = vrot.slane %v1719_v29, %v3837_v20  ;;  %v1744_v54 = vrot.slane %v1719_v29, %v5100_v43  ;;  %v1748_v19 = vrot.slane %v1719_v29, %v5101_v32 }
 0x23e   : > { %v1752_v45 = vrot.slane %v1719_v29, %v5102_v12  ;;  %v1760_v62 = vrot.slane %v1719_v29, %v5104_v56 }
 0x23f   : > { %v1893_v63 = vsub.f32 %v4261_v31, %v1736_v36  ;;  %v1894_v30 = vsub.f32 %v4263_v17, %v1740_v22  ;;  %v1895_v3 = vsub.f32 %v4255_v38, %v1744_v54  ;;  %v1896_v2 = vsub.f32 %v4269_v18, %v1748_v19  ;;  %v5103_v38 = vld [vmem:[#allocation5_spill] sm:$0xff] }
 0x240   : > { %v4422_v33 = vpop.xlane.xlu1 %1724  ;;  %v1756_v6 = vrot.slane %v1719_v29, %v5103_v38  ;;  %v1897_v51 = vsub.f32 %v4281_v21, %v1752_v45 }
 0x241   : > { %v1925_v7 = vmul.f32 1.442695, %v1893_v63  ;;  %v1927_v0 = vmul.f32 1.442695, %v1894_v30  ;;  %v1800_v41 = vrot.slane %v4422_v33, %v3830_v16  ;;  %v1929_v15 = vmul.f32 1.442695, %v1895_v3 }
 0x242   : > { %v1808_v31 = vrot.slane %v4422_v33, %v5100_v43  ;;  %v1931_v14 = vmul.f32 1.442695, %v1896_v2  ;;  %v1812_v24 = vrot.slane %v4422_v33, %v5101_v32  ;;  %v1898_v40 = vsub.f32 %v4304_v59, %v1756_v6  ;;  %v5105_v59 = vld [vmem:[#allocation7_spill] sm:$0xff] }
 0x243   : > { %3579 = vpow2.f32 %v1925_v7  ;;  %v1909_v17 = vsub.f32 %v4265_v9, %v1800_v41  ;;  %v1933_v26 = vmul.f32 1.442695, %v1897_v51  ;;  %v1820_v9 = vrot.slane %v4422_v33, %v5103_v38 }
 0x244   : > { %3581 = vpow2.f32 %v1927_v0  ;;  %v1911_v61 = vsub.f32 %v4257_v49, %v1808_v31  ;;  %v1912_v39 = vsub.f32 %v4259_v4, %v1812_v24  ;;  %v1899_v49 = vsub.f32 %v4271_v27, %v1760_v62 }
 0x245   : > { %3583 = vpow2.f32 %v1929_v15  ;;  %v1957_v18 = vmul.f32 1.442695, %v1909_v17  ;;  %v1935_v22 = vmul.f32 1.442695, %v1898_v40  ;;  %v1764_v54 = vrot.slane %v1719_v29, %v5105_v59 }
 0x246   : > { %3585 = vpow2.f32 %v1931_v14  ;;  %v1961_v21 = vmul.f32 1.442695, %v1911_v61  ;;  %v1914_v19 = vsub.f32 %v4320_v47, %v1820_v9  ;;  %v1963_v63 = vmul.f32 1.442695, %v1912_v39 }
 0x247   : > { %3587 = vpow2.f32 %v1957_v18  ;;  %v1937_v30 = vmul.f32 1.442695, %v1899_v49  ;;  %v1900_v27 = vsub.f32 %v4290_v1, %v1764_v54  ;;  %v1804_v3 = vrot.slane %v4422_v33, %v3837_v20 }
 0x248   : > { %3589 = vpow2.f32 %v1933_v26  ;;  %v1967_v7 = vmul.f32 1.442695, %v1914_v19  ;;  %v1816_v41 = vrot.slane %v4422_v33, %v5102_v12  ;;  %v1824_v17 = vrot.slane %v4422_v33, %v5104_v56 }
 0x249   : > { %3591 = vpow2.f32 %v1961_v21  ;;  %v1939_v0 = vmul.f32 1.442695, %v1900_v27  ;;  %v1910_v1 = vsub.f32 %v4267_v37, %v1804_v3  ;;  %v1828_v18 = vrot.slane %v4422_v33, %v5105_v59 }
 0x24a   : > { %3593 = vpow2.f32 %v1935_v22  ;;  %v1913_v37 = vsub.f32 %v4277_v23, %v1816_v41  ;;  %v1915_v40 = vsub.f32 %v4273_v34, %v1824_v17 }
 0x24b   : > { %3595 = vpow2.f32 %v1963_v63  ;;  %v1959_v6 = vmul.f32 1.442695, %v1910_v1  ;;  %v1916_v33 = vsub.f32 %v4296_v44, %v1828_v18 }
 0x24c   : > { %3597 = vpow2.f32 %v1937_v30  ;;  %v1965_v23 = vmul.f32 1.442695, %v1913_v37  ;;  %v1969_v34 = vmul.f32 1.442695, %v1915_v40 }
 0x24d   : > { %v4441_v50 = vpop.eup %3579  ;;  %3599 = vpow2.f32 %v1967_v7  ;;  %v1971_v63 = vmul.f32 1.442695, %v1916_v33 }
 0x24e   : > { %v4443_v36 = vpop.eup %3581  ;;  %2022 = vperm.xlu1 %3475, %v4441_v50   ;;  %3601 = vpow2.f32 %v1939_v0 }
 0x24f   : > { %2025 = vperm.xlu0 %3476, %v4443_v36   ;;  %v4450_v4 = vpop.eup %3583  ;;  %3603 = vpow2.f32 %v1959_v6 }
 0x250   : > { %v4456_v29 = vpop.eup %3585 }
 0x251   : > { %v4458_v47 = vpop.eup %3587 }
 0x252   : > { %2028 = vperm.xlu1 %3475, %v4450_v4   ;;  %v4465_v45 = vpop.eup %3589 }
 0x253   : > { %2070 = vperm.xlu0 %3476, %v4458_v47   ;;  %v4467_v2 = vpop.eup %3591 }
 0x254   : > { %v4478_v51 = vpop.eup %3593 }
 0x255   : > { %v4481_v24 = vpop.eup %3595 }
 0x256   : > { %2031 = vperm.xlu1 %3475, %v4456_v29   ;;  %v4490_v26 = vpop.eup %3597 }
 0x257   : > { %2076 = vperm.xlu0 %3476, %v4467_v2   ;;  %v4494_v9 = vpop.eup %3599 }
 0x258   : > { %v4504_v22 = vpop.eup %3601 }
 0x259   : > { %v4469_v15 = vpop.xlane.xlu0 %1721  ;;  %v4513_v3 = vpop.eup %3603 }
 0x25a   : > { %2034 = vperm.xlu1 %3475, %v4465_v45   ;;  %v1776_v31 = vrot.slane %v4469_v15, %v5100_v43  ;;  %v1788_v39 = vrot.slane %v4469_v15, %v5103_v38  ;;  %v1768_v21 = vrot.slane %v4469_v15, %v3830_v16  ;;  %v1772_v30 = vrot.slane %v4469_v15, %v3837_v20 }
 0x25b   : > { %2079 = vperm.xlu0 %3476, %v4481_v24   ;;  %v1780_v0 = vrot.slane %v4469_v15, %v5101_v32 }
 0x25c   : > { %v1903_v14 = vsub.f32 %v4336_v46, %v1776_v31  ;;  %v1906_v54 = vsub.f32 %v4389_v13, %v1788_v39  ;;  %v1901_v27 = vsub.f32 %v4327_v57, %v1768_v21  ;;  %v1902_v41 = vsub.f32 %v4355_v35, %v1772_v30 }
 0x25d   : > { %v4483_v61 = vpop.xlane.xlu0 %1727  ;;  %v1904_v6 = vsub.f32 %v4347_v42, %v1780_v0  ;;  %v1784_v42 = vrot.slane %v4469_v15, %v5102_v12 }
 0x25e   : > { %v1945_v62 = vmul.f32 1.442695, %v1903_v14  ;;  %2037 = vperm.xlu1 %3475, %v4478_v51   ;;  %v1836_v46 = vrot.slane %v4483_v61, %v3837_v20  ;;  %v1844_v19 = vrot.slane %v4483_v61, %v5101_v32  ;;  %v1951_v7 = vmul.f32 1.442695, %v1906_v54 }
 0x25f   : > { %2085 = vperm.xlu0 %3476, %v4494_v9   ;;  %v1941_v1 = vmul.f32 1.442695, %v1901_v27  ;;  %v1943_v35 = vmul.f32 1.442695, %v1902_v41  ;;  %v1832_v14 = vrot.slane %v4483_v61, %v3830_v16  ;;  %v1840_v54 = vrot.slane %v4483_v61, %v5100_v43 }
 0x260   : > { %3605 = vpow2.f32 %v1945_v62  ;;  %v1918_v49 = vsub.f32 %v4345_v11, %v1836_v46  ;;  %v1796_v11 = vrot.slane %v4469_v15, %v5105_v59  ;;  %v1920_v13 = vsub.f32 %v4340_v55, %v1844_v19 }
 0x261   : > { %3607 = vpow2.f32 %v1965_v23  ;;  %v1852_v55 = vrot.slane %v4483_v61, %v5103_v38  ;;  %v1947_v46 = vmul.f32 1.442695, %v1904_v6  ;;  %v1917_v39 = vsub.f32 %v4343_v58, %v1832_v14 }
 0x262   : > { %2040 = vperm.xlu1 %3475, %v4490_v26   ;;  %v1975_v44 = vmul.f32 1.442695, %v1918_v49  ;;  %3609 = vpow2.f32 %v1969_v34  ;;  %v1908_v17 = vsub.f32 %v4367_v28, %v1796_v11  ;;  %v1979_v37 = vmul.f32 1.442695, %v1920_v13 }
 0x263   : > { %v1856_v28 = vrot.slane %v4483_v61, %v5104_v56  ;;  %v1922_v40 = vsub.f32 %v4383_v10, %v1852_v55  ;;  %v1905_v49 = vsub.f32 %v4359_v52, %v1784_v42  ;;  %v1973_v19 = vmul.f32 1.442695, %v1917_v39 }
 0x264   : > { %3611 = vpow2.f32 %v1975_v44  ;;  %v1955_v62 = vmul.f32 1.442695, %v1908_v17  ;;  %v1919_v52 = vsub.f32 %v4308_v48, %v1840_v54  ;;  %v1848_v13 = vrot.slane %v4483_v61, %v5102_v12 }
 0x265   : > { %3613 = vpow2.f32 %v1971_v63  ;;  %v1923_v34 = vsub.f32 %v4399_v53, %v1856_v28  ;;  %v1983_v10 = vmul.f32 1.442695, %v1922_v40  ;;  %v1792_v63 = vrot.slane %v4469_v15, %v5104_v56 }
 0x266   : > { %2043 = vperm.xlu1 %3475, %v4504_v22   ;;  %3615 = vpow2.f32 %v1951_v7  ;;  %v1949_v30 = vmul.f32 1.442695, %v1905_v49  ;;  %v1977_v15 = vmul.f32 1.442695, %v1919_v52  ;;  %v1921_v17 = vsub.f32 %v4372_v8, %v1848_v13 }
 0x267   : > { %3617 = vpow2.f32 %v1941_v1  ;;  %v1985_v44 = vmul.f32 1.442695, %v1923_v34  ;;  %v1907_v7 = vsub.f32 %v4349_v60, %v1792_v63  ;;  %v1860_v1 = vrot.slane %v4483_v61, %v5105_v59 }
 0x268   : > { %3619 = vpow2.f32 %v1979_v37  ;;  %v1981_v6 = vmul.f32 1.442695, %v1921_v17 }
 0x269   : > { %3621 = vpow2.f32 %v1943_v35  ;;  %v1953_v41 = vmul.f32 1.442695, %v1907_v7  ;;  %v1924_v37 = vsub.f32 %v4405_v25, %v1860_v1 }
 0x26a   : > { %2073 = vperm.xlu1 %3475, %v4513_v3   ;;  %v4522_v31 = vpop.eup %3605  ;;  %3623 = vpow2.f32 %v1955_v62 }
 0x26b   : > { %v4524_v57 = vpop.eup %3607  ;;  %2052 = vperm.xlu0 %3476, %v4522_v31   ;;  %3625 = vpow2.f32 %v1947_v46  ;;  %v1987_v8 = vmul.f32 1.442695, %v1924_v37 }
 0x26c   : > { %v4534_v18 = vpop.eup %3609  ;;  %3627 = vpow2.f32 %v1983_v10 }
 0x26d   : > { %3629 = vpow2.f32 %v1973_v19 }
 0x26e   : > { %2082 = vperm.xlu1 %3475, %v4524_v57   ;;  %v4540_v23 = vpop.eup %3611  ;;  %3631 = vpow2.f32 %v1985_v44 }
 0x26f   : > { %2097 = vperm.xlu0 %3476, %v4540_v23   ;;  %v4546_v33 = vpop.eup %3613  ;;  %3633 = vpow2.f32 %v1949_v30 }
 0x270   : > { %v4550_v21 = vpop.eup %3615  ;;  %3635 = vpow2.f32 %v1977_v15 }
 0x271   : > { %v4556_v58 = vpop.eup %3617  ;;  %3637 = vpow2.f32 %v1953_v41 }
 0x272   : > { %2088 = vperm.xlu1 %3475, %v4534_v18   ;;  %v4559_v53 = vpop.eup %3619  ;;  %3639 = vpow2.f32 %v1981_v6 }
 0x273   : > { %2061 = vperm.xlu0 %3476, %v4550_v21   ;;  %v4565_v27 = vpop.eup %3621  ;;  %3641 = vpow2.f32 %v1987_v8 }
 0x274   : > { %v4568_v11 = vpop.eup %3623 }
 0x275   : > { %v4574_v48 = vpop.eup %3625 }
 0x276   : > { %2091 = vperm.xlu1 %3475, %v4546_v33   ;;  %v4577_v0 = vpop.eup %3627 }
 0x277   : > { %2103 = vperm.xlu0 %3476, %v4559_v53   ;;  %v4583_v60 = vpop.eup %3629 }
 0x278   : > { %v4586_v55 = vpop.eup %3631 }
 0x279   : > { %v4590_v35 = vpop.eup %3633 }
 0x27a   : > { %2046 = vperm.xlu1 %3475, %v4556_v58   ;;  %v4593_v61 = vpop.eup %3635 }
 0x27b   : > { %2067 = vperm.xlu0 %3476, %v4568_v11   ;;  %v4596_v14 = vpop.eup %3637 }
 0x27c   : > { %v4599_v62 = vpop.eup %3639 }
 0x27d   : > { %v4602_v25 = vpop.eup %3641 }
 0x27e   : > { %2049 = vperm.xlu1 %3475, %v4565_v27  }
 0x27f   : > { %2109 = vperm.xlu0 %3476, %v4577_v0  }
 0x282   : > { %2055 = vperm.xlu1 %3475, %v4574_v48  }
 0x283   : > { %2112 = vperm.xlu0 %3476, %v4586_v55  }
 0x286   : > { %2094 = vperm.xlu1 %3475, %v4583_v60  }
 0x28a   : > { %2058 = vperm.xlu1 %3475, %v4590_v35  }
 0x28e   : > { %2100 = vperm.xlu1 %3475, %v4593_v61  }
 0x292   : > { %2064 = vperm.xlu1 %3475, %v4596_v14  }
 0x296   : > { %2106 = vperm.xlu1 %3475, %v4599_v62  }
 0x29a   : > { %2115 = vperm.xlu1 %3475, %v4602_v25  }
 0x2cd   : > { %v2023_v28 = vpop.permute.xlu1 %2022 }
 0x2ce   : > { %v2026_v42 = vpop.permute.xlu0 %2025  ;;  %v2120_v54 = vrot.slane %v2023_v28, %v3794_v5 }
 0x2cf   : > { %v2124_v49 = vrot.slane %v2026_v42, %v3794_v5 }
 0x2d1   : > { %v2029_v40 = vpop.permute.xlu1 %2028  ;;  %v2245_v7 = vsel %vm1677_vm1, %v2124_v49, %v2120_v54 }
 0x2d2   : > { %v2071_v34 = vpop.permute.xlu0 %2070  ;;  %v2128_v19 = vrot.slane %v2029_v40, %v3794_v5 }
 0x2d4   : > { %v2246_v15 = vsel %vm1679_vm2, %v2128_v19, %v2245_v7 }
 0x2d5   : > { %v2032_v46 = vpop.permute.xlu1 %2031 }
 0x2d6   : > { %v2132_v44 = vrot.slane %v2032_v46, %v3794_v5  ;;  %v2077_v63 = vpop.permute.xlu0 %2076 }
 0x2d7   : > { %v2192_v54 = vrot.slane %v2077_v63, %v3794_v5 }
 0x2d8   : > { %v2247_v1 = vsel %vm1681_vm3, %v2132_v44, %v2246_v15 }
 0x2d9   : > { %v2035_v39 = vpop.permute.xlu1 %2034 }
 0x2da   : > { %v2136_v30 = vrot.slane %v2035_v39, %v3794_v5  ;;  %v2080_v28 = vpop.permute.xlu0 %2079 }
 0x2db   : > { %v2196_v7 = vrot.slane %v2080_v28, %v3794_v5 }
 0x2dc   : > { %v2248_v17 = vsel %vm1683_vm4, %v2136_v30, %v2247_v1 }
 0x2dd   : > { %v2038_v10 = vpop.permute.xlu1 %2037 }
 0x2de   : > { %v2140_v13 = vrot.slane %v2038_v10, %v3794_v5  ;;  %v2184_v10 = vrot.slane %v2071_v34, %v3794_v5  ;;  %v2086_v44 = vpop.permute.xlu0 %2085 }
 0x2df   : > { %v2204_v63 = vrot.slane %v2086_v44, %v3794_v5 }
 0x2e0   : > { %v2249_v6 = vsel %vm1685_vm5, %v2140_v13, %v2248_v17 }
 0x2e1   : > { %v2041_v52 = vpop.permute.xlu1 %2040 }
 0x2e2   : > { %v2144_v41 = vrot.slane %v2041_v52, %v3794_v5 }
 0x2e4   : > { %v2250_v40 = vsel %vm1687_vm6, %v2144_v41, %v2249_v6 }
 0x2e5   : > { %v2044_v37 = vpop.permute.xlu1 %2043 }
 0x2e6   : > { %v2148_v8 = vrot.slane %v2044_v37, %v3794_v5 }
 0x2e8   : > { %v2251_v42 = vsel %vm1689_vm7, %v2148_v8, %v2250_v40 }
 0x2e9   : > { %v2074_v46 = vpop.permute.xlu1 %2073  ;;  %v2277_v39 = vsel %vm1716_vm8, %v2251_v42, 0.0 }
 0x2ea   : > { %v2188_v49 = vrot.slane %v2074_v46, %v3794_v5  ;;  %2278 = vadd.xlane.f32.xlu0 %v2277_v39  ;;  %v2053_v41 = vpop.permute.xlu0 %2052 }
 0x2ec   : > { %v2259_v19 = vsel %vm1677_vm1, %v2188_v49, %v2184_v10 }
 0x2ed   : > { %v2260_v30 = vsel %vm1679_vm2, %v2192_v54, %v2259_v19  ;;  %v2083_v52 = vpop.permute.xlu1 %2082 }
 0x2ee   : > { %v2200_v13 = vrot.slane %v2083_v52, %v3794_v5  ;;  %v2261_v15 = vsel %vm1681_vm3, %v2196_v7, %v2260_v30  ;;  %v2098_v40 = vpop.permute.xlu0 %2097 }
 0x2f0   : > { %v2262_v34 = vsel %vm1683_vm4, %v2200_v13, %v2261_v15 }
 0x2f1   : > { %v2089_v1 = vpop.permute.xlu1 %2088  ;;  %v2263_v8 = vsel %vm1685_vm5, %v2204_v63, %v2262_v34  ;;  %v2160_v34 = vrot.slane %v2053_v41, %v3794_v5 }
 0x2f2   : > { %v2208_v17 = vrot.slane %v2089_v1, %v3794_v5  ;;  %v2062_v10 = vpop.permute.xlu0 %2061 }
 0x2f4   : > { %v2264_v28 = vsel %vm1687_vm6, %v2208_v17, %v2263_v8 }
 0x2f5   : > { %v2092_v37 = vpop.permute.xlu1 %2091 }
 0x2f6   : > { %v2212_v6 = vrot.slane %v2092_v37, %v3794_v5  ;;  %v2104_v19 = vpop.permute.xlu0 %2103 }
 0x2f8   : > { %v2265_v42 = vsel %vm1689_vm7, %v2212_v6, %v2264_v28 }
 0x2f9   : > { %v2047_v46 = vpop.permute.xlu1 %2046  ;;  %v2283_v39 = vsel %vm1716_vm8, %v2265_v42, 0.0 }
 0x2fa   : > { %2284 = vadd.xlane.f32.xlu0 %v2283_v39  ;;  %v2152_v52 = vrot.slane %v2047_v46, %v3794_v5  ;;  %v2068_v7 = vpop.permute.xlu0 %2067  ;;  %v2220_v39 = vrot.slane %v2098_v40, %v3794_v5 }
 0x2fd   : > { %v2050_v49 = vpop.permute.xlu1 %2049 }
 0x2fe   : > { %v2156_v44 = vrot.slane %v2050_v49, %v3794_v5  ;;  %v2110_v8 = vpop.permute.xlu0 %2109  ;;  %v2172_v49 = vrot.slane %v2062_v10, %v3794_v5 }
 0x300   : > { %v2252_v15 = vsel %vm1677_vm1, %v2156_v44, %v2152_v52  ;;  %v2180_v44 = vrot.slane %v2068_v7, %v3794_v5  ;;  %v2236_v7 = vrot.slane %v2110_v8, %v3794_v5 }
 0x301   : > { %v2056_v54 = vpop.permute.xlu1 %2055  ;;  %v2253_v37 = vsel %vm1679_vm2, %v2160_v34, %v2252_v15 }
 0x302   : > { %v2164_v1 = vrot.slane %v2056_v54, %v3794_v5  ;;  %v2113_v34 = vpop.permute.xlu0 %2112 }
 0x304   : > { %v2254_v6 = vsel %vm1681_vm3, %v2164_v1, %v2253_v37  ;;  %v2228_v1 = vrot.slane %v2104_v19, %v3794_v5 }
 0x305   : > { %v2095_v30 = vpop.permute.xlu1 %2094 }
 0x306   : > { %v2216_v28 = vrot.slane %v2095_v30, %v3794_v5 }
 0x308   : > { %v2266_v52 = vsel %vm1677_vm1, %v2220_v39, %v2216_v28 }
 0x309   : > { %v2059_v13 = vpop.permute.xlu1 %2058 }
 0x30a   : > { %v2168_v17 = vrot.slane %v2059_v13, %v3794_v5 }
 0x30c   : > { %v2255_v42 = vsel %vm1683_vm4, %v2168_v17, %v2254_v6  ;;  %v2240_v6 = vrot.slane %v2113_v34, %v3794_v5 }
 0x30d   : > { %v2101_v63 = vpop.permute.xlu1 %2100  ;;  %v2256_v13 = vsel %vm1685_vm5, %v2172_v49, %v2255_v42 }
 0x30e   : > { %v2224_v46 = vrot.slane %v2101_v63, %v3794_v5 }
 0x310   : > { %v2267_v15 = vsel %vm1679_vm2, %v2224_v46, %v2266_v52 }
 0x311   : > { %v2065_v54 = vpop.permute.xlu1 %2064  ;;  %v2268_v37 = vsel %vm1681_vm3, %v2228_v1, %v2267_v15 }
 0x312   : > { %v2176_v41 = vrot.slane %v2065_v54, %v3794_v5 }
 0x314   : > { %v2257_v30 = vsel %vm1687_vm6, %v2176_v41, %v2256_v13 }
 0x315   : > { %v2107_v17 = vpop.permute.xlu1 %2106  ;;  %v2258_v40 = vsel %vm1689_vm7, %v2180_v44, %v2257_v30 }
 0x316   : > { %v2232_v10 = vrot.slane %v2107_v17, %v3794_v5  ;;  %v2280_v63 = vsel %vm1716_vm8, %v2258_v40, 0.0 }
 0x317   : > { %2281 = vadd.xlane.f32.xlu1 %v2280_v63 }
 0x318   : > { %v2269_v28 = vsel %vm1683_vm4, %v2232_v10, %v2268_v37 }
 0x319   : > { %v2116_v42 = vpop.permute.xlu1 %2115  ;;  %v2270_v19 = vsel %vm1685_vm5, %v2236_v7, %v2269_v28 }
 0x31a   : > { %v2244_v46 = vrot.slane %v2116_v42, %v3794_v5  ;;  %v2271_v39 = vsel %vm1687_vm6, %v2240_v6, %v2270_v19 }
 0x31c   : > { %v2272_v49 = vsel %vm1689_vm7, %v2244_v46, %v2271_v39 }
 0x31d   : > { %v2286_v54 = vsel %vm1716_vm8, %v2272_v49, 0.0 }
 0x31e   : > { %2287 = vadd.xlane.f32.xlu0 %v2286_v54 }
 0x377   : > { %v2279_v8 = vpop.xlane.xlu0 %2278 }
 0x378   : > { %v2296_v41 = vrot.slane %v2279_v8, %v3830_v16  ;;  %v2300_v44 = vrot.slane %v2279_v8, %v3837_v20  ;;  %v2304_v52 = vrot.slane %v2279_v8, %v5100_v43  ;;  %v2312_v13 = vrot.slane %v2279_v8, %v5102_v12 }
 0x379   : > { %v2308_v15 = vrot.slane %v2279_v8, %v5101_v32  ;;  %v2320_v30 = vrot.slane %v2279_v8, %v5104_v56  ;;  %v2316_v1 = vrot.slane %v2279_v8, %v5103_v38  ;;  %v2324_v17 = vrot.slane %v2279_v8, %v5105_v59 }
 0x37a   : > { %3643 = vrcp.f32 %v2296_v41 }
 0x37b   : > { %3645 = vrcp.f32 %v2300_v44 }
 0x37c   : > { %3647 = vrcp.f32 %v2304_v52 }
 0x37d   : > { %3649 = vrcp.f32 %v2312_v13 }
 0x37e   : > { %3651 = vrcp.f32 %v2308_v15 }
 0x37f   : > { %3653 = vrcp.f32 %v2320_v30 }
 0x380   : > { %3655 = vrcp.f32 %v2316_v1 }
 0x381   : > { %3657 = vrcp.f32 %v2324_v17 }
 0x384   : > { %v3644_v34 = vpop.eup %3643 }
 0x385   : > { %v3646_v40 = vpop.eup %3645  ;;  %v2454_v10 = vmul.f32 %v3644_v34, %v4441_v50 }
 0x386   : > { %v3648_v63 = vpop.eup %3647  ;;  %v2456_v7 = vmul.f32 %v3646_v40, %v4443_v36 }
 0x387   : > { %v3650_v37 = vpop.eup %3649  ;;  %v2285_v6 = vpop.xlane.xlu0 %2284  ;;  %2550 = vperm.xlu1 %3475, %v2454_v10   ;;  %v2458_v46 = vmul.f32 %v3648_v63, %v4450_v4 }
 0x388   : > { %2553 = vperm.xlu0 %3476, %v2456_v7   ;;  %v2364_v28 = vrot.slane %v2285_v6, %v3837_v20  ;;  %v2360_v42 = vrot.slane %v2285_v6, %v3830_v16  ;;  %v2368_v19 = vrot.slane %v2285_v6, %v5100_v43  ;;  %v3652_v39 = vpop.eup %3651  ;;  %v2462_v49 = vmul.f32 %v3650_v37, %v4465_v45 }
 0x389   : > { %v3654_v50 = vpop.eup %3653  ;;  %v2376_v36 = vrot.slane %v2285_v6, %v5102_v12  ;;  %v2372_v54 = vrot.slane %v2285_v6, %v5101_v32  ;;  %v2460_v8 = vmul.f32 %v3652_v39, %v4456_v29  ;;  %v2384_v4 = vrot.slane %v2285_v6, %v5104_v56 }
 0x38a   : > { %3659 = vrcp.f32 %v2364_v28  ;;  %v3656_v41 = vpop.eup %3655  ;;  %v2466_v44 = vmul.f32 %v3654_v50, %v4490_v26  ;;  %v2380_v45 = vrot.slane %v2285_v6, %v5103_v38  ;;  %v2388_v29 = vrot.slane %v2285_v6, %v5105_v59 }
 0x38b   : > { %2556 = vperm.xlu1 %3475, %v2458_v46   ;;  %3661 = vrcp.f32 %v2360_v42  ;;  %v2464_v52 = vmul.f32 %v3656_v41, %v4478_v51  ;;  %v3658_v13 = vpop.eup %3657 }
 0x38c   : > { %2562 = vperm.xlu0 %3476, %v2462_v49   ;;  %3663 = vrcp.f32 %v2368_v19  ;;  %v2468_v26 = vmul.f32 %v3658_v13, %v4504_v22 }
 0x38d   : > { %3665 = vrcp.f32 %v2376_v36 }
 0x38e   : > { %3667 = vrcp.f32 %v2372_v54 }
 0x38f   : > { %2559 = vperm.xlu1 %3475, %v2460_v8   ;;  %3669 = vrcp.f32 %v2384_v4 }
 0x390   : > { %2568 = vperm.xlu0 %3476, %v2466_v44   ;;  %3671 = vrcp.f32 %v2380_v45 }
 0x391   : > { %3673 = vrcp.f32 %v2388_v29 }
 0x393   : > { %2565 = vperm.xlu1 %3475, %v2464_v52  }
 0x394   : > { %v3660_v15 = vpop.eup %3659 }
 0x395   : > { %v3662_v30 = vpop.eup %3661  ;;  %v2488_v1 = vmul.f32 %v3660_v15, %v4513_v3 }
 0x396   : > { %v3664_v34 = vpop.eup %3663  ;;  %v2486_v40 = vmul.f32 %v3662_v30, %v4458_v47 }
 0x397   : > { %2571 = vperm.xlu1 %3475, %v2468_v26   ;;  %2601 = vperm.xlu0 %3476, %v2488_v1   ;;  %v3666_v17 = vpop.eup %3665  ;;  %v2490_v51 = vmul.f32 %v3664_v34, %v4467_v2 }
 0x398   : > { %v3668_v10 = vpop.eup %3667  ;;  %v2494_v7 = vmul.f32 %v3666_v17, %v4524_v57 }
 0x399   : > { %v3670_v63 = vpop.eup %3669  ;;  %v2492_v37 = vmul.f32 %v3668_v10, %v4481_v24 }
 0x39a   : > { %v3672_v22 = vpop.eup %3671  ;;  %v2498_v3 = vmul.f32 %v3670_v63, %v4534_v18 }
 0x39b   : > { %2598 = vperm.xlu1 %3475, %v2486_v40   ;;  %2604 = vperm.xlu0 %3476, %v2490_v51   ;;  %v2496_v6 = vmul.f32 %v3672_v22, %v4494_v9  ;;  %v3674_v28 = vpop.eup %3673 }
 0x39c   : > { %v2500_v2 = vmul.f32 %v3674_v28, %v4546_v33 }
 0x39f   : > { %2610 = vperm.xlu1 %3475, %v2494_v7   ;;  %2607 = vperm.xlu0 %3476, %v2492_v37  }
 0x3a3   : > { %2616 = vperm.xlu1 %3475, %v2498_v3   ;;  %2613 = vperm.xlu0 %3476, %v2496_v6  }
 0x3a4   : > { %v2282_v47 = vpop.xlane.xlu1 %2281 }
 0x3a5   : > { %v2332_v42 = vrot.slane %v2282_v47, %v3837_v20  ;;  %v2328_v19 = vrot.slane %v2282_v47, %v3830_v16  ;;  %v2340_v57 = vrot.slane %v2282_v47, %v5101_v32  ;;  %v2336_v24 = vrot.slane %v2282_v47, %v5100_v43 }
 0x3a6   : > { %v2344_v33 = vrot.slane %v2282_v47, %v5102_v12  ;;  %v2348_v39 = vrot.slane %v2282_v47, %v5103_v38  ;;  %v2352_v44 = vrot.slane %v2282_v47, %v5104_v56 }
 0x3a7   : > { %2619 = vperm.xlu1 %3475, %v2500_v2   ;;  %3675 = vrcp.f32 %v2332_v42  ;;  %v4745_v42 = vld [vmem:[%s3799_s12 + $0x18] sm:$0xff]  }
 0x3a8   : > { %3677 = vrcp.f32 %v2328_v19  ;;  %v2823_v19 = vunpack.c.l.bf16 %v4745_v42 }
 0x3a9   : > { %3679 = vrcp.f32 %v2340_v57 }
 0x3aa   : > { %3681 = vrcp.f32 %v2336_v24 }
 0x3ab   : > { %v2288_v9 = vpop.xlane.xlu0 %2287 }
 0x3ac   : > { %v2392_v18 = vrot.slane %v2288_v9, %v3830_v16  ;;  %v2396_v46 = vrot.slane %v2288_v9, %v3837_v20  ;;  %v2400_v50 = vrot.slane %v2288_v9, %v5100_v43  ;;  %v2404_v8 = vrot.slane %v2288_v9, %v5101_v32 }
 0x3ad   : > { %v2356_v43 = vrot.slane %v2282_v47, %v5105_v59  ;;  %v2412_v15 = vrot.slane %v2288_v9, %v5103_v38  ;;  %v4741_v47 = vld [vmem:[%s3799_s12 + $0x10] sm:$0xff]  }
 0x3ae   : > { %3683 = vrcp.f32 %v2392_v18  ;;  %v2821_v2 = vunpack.c.l.bf16 %v4741_v47  ;;  %v2824_v18 = vunpack.c.h.bf16 %v4745_v42 }
 0x3af   : > { %3685 = vrcp.f32 %v2396_v46  ;;  %v4752_v46 = vld [vmem:[%s3799_s12 + $0x48] sm:$0xff]  }
 0x3b0   : > { %3687 = vrcp.f32 %v2344_v33  ;;  %v2835_v33 = vunpack.c.l.bf16 %v4752_v46 }
 0x3b1   : > { %v3676_v49 = vpop.eup %3675  ;;  %3689 = vrcp.f32 %v2348_v39 }
 0x3b2   : > { %v3678_v36 = vpop.eup %3677  ;;  %v2472_v54 = vmul.f32 %v3676_v49, %v4565_v27  ;;  %3691 = vrcp.f32 %v2400_v50 }
 0x3b3   : > { %v3680_v41 = vpop.eup %3679  ;;  %v2470_v16 = vmul.f32 %v3678_v36, %v4556_v58  ;;  %3693 = vrcp.f32 %v2404_v8  ;;  %v2408_v58 = vrot.slane %v2288_v9, %v5102_v12  ;;  %v2836_v36 = vunpack.c.h.bf16 %v4752_v46 }
 0x3b4   : > { %v3682_v20 = vpop.eup %3681  ;;  %2577 = vperm.xlu1 %3475, %v2472_v54   ;;  %v2476_v4 = vmul.f32 %v3680_v41, %v4574_v48  ;;  %3695 = vrcp.f32 %v2352_v44  ;;  %v4758_v54 = vld [vmem:[%s3799_s12 + $0x50] sm:$0xff]  }
 0x3b5   : > { %2574 = vperm.xlu0 %3476, %v2470_v16   ;;  %v2474_v45 = vmul.f32 %v3682_v20, %v4522_v31  ;;  %3697 = vrcp.f32 %v2356_v43  ;;  %v2420_v31 = vrot.slane %v2288_v9, %v5105_v59  ;;  %v2837_v8 = vunpack.c.l.bf16 %v4758_v54 }
 0x3b6   : > { %3699 = vrcp.f32 %v2408_v58  ;;  %v2838_v44 = vunpack.c.h.bf16 %v4758_v54 }
 0x3b7   : > { %3701 = vrcp.f32 %v2412_v15 }
 0x3b8   : > { %v3684_v27 = vpop.eup %3683  ;;  %2583 = vperm.xlu1 %3475, %v2476_v4   ;;  %3703 = vrcp.f32 %v2420_v31  ;;  %v4763_v4 = vld [vmem:[%s3799_s12 + $0x58] sm:$0xff]  }
 0x3b9   : > { %v3686_v52 = vpop.eup %3685  ;;  %2580 = vperm.xlu0 %3476, %v2474_v45   ;;  %v2502_v32 = vmul.f32 %v3684_v27, %v4583_v60  ;;  %v2416_v60 = vrot.slane %v2288_v9, %v5104_v56  ;;  %v2822_v9 = vunpack.c.h.bf16 %v4741_v47  ;;  %v2839_v43 = vunpack.c.l.bf16 %v4763_v4 }
 0x3ba   : > { %v2504_v13 = vmul.f32 %v3686_v52, %v4540_v23  ;;  %v3688_v48 = vpop.eup %3687  ;;  %v2840_v52 = vunpack.c.h.bf16 %v4763_v4 }
 0x3bb   : > { %v3690_v29 = vpop.eup %3689  ;;  %v2478_v30 = vmul.f32 %v3688_v48, %v4590_v35  ;;  %3705 = vrcp.f32 %v2416_v60 }
 0x3bc   : > { %2622 = vperm.xlu1 %3475, %v2502_v32   ;;  %v3692_v26 = vpop.eup %3691  ;;  %v2480_v12 = vmul.f32 %v3690_v29, %v4550_v21  ;;  %v4768_v32 = vld [vmem:[%s3799_s12 + $0x20] sm:$0xff]  }
 0x3bd   : > { %2625 = vperm.xlu0 %3476, %v2504_v13   ;;  %v3694_v1 = vpop.eup %3693  ;;  %v2506_v38 = vmul.f32 %v3692_v26, %v4593_v61  ;;  %v2825_v58 = vunpack.c.l.bf16 %v4768_v32 }
 0x3be   : > { %v3696_v23 = vpop.eup %3695  ;;  %v2508_v34 = vmul.f32 %v3694_v1, %v4559_v53 }
 0x3bf   : > { %v3698_v17 = vpop.eup %3697  ;;  %v2482_v59 = vmul.f32 %v3696_v23, %v4596_v14 }
 0x3c0   : > { %2586 = vperm.xlu1 %3475, %v2478_v30   ;;  %v3700_v56 = vpop.eup %3699  ;;  %v2484_v35 = vmul.f32 %v3698_v17, %v4568_v11  ;;  %v3707_v11 = vld [vmem:[%s3799_s12] sm:$0xff]  }
 0x3c1   : > { %2589 = vperm.xlu0 %3476, %v2480_v12   ;;  %v3702_v21 = vpop.eup %3701  ;;  %v2510_v40 = vmul.f32 %v3700_v56, %v4599_v62  ;;  %v2817_v63 = vunpack.c.l.bf16 %v3707_v11  ;;  %v2818_v7 = vunpack.c.h.bf16 %v3707_v11  ;;  %v4735_v62 = vld [vmem:[%s3799_s12 + $0x40] sm:$0xff]   ;;  %v2826_v12 = vunpack.c.h.bf16 %v4768_v32 }
 0x3c2   : > { %v3704_v61 = vpop.eup %3703  ;;  %v2512_v51 = vmul.f32 %v3702_v21, %v4577_v0  ;;  %v2833_v0 = vunpack.c.l.bf16 %v4735_v62  ;;  %v2834_v22 = vunpack.c.h.bf16 %v4735_v62  ;;  %v4779_v21 = vld [vmem:[%s3799_s12 + $0x28] sm:$0xff]  }
 0x3c3   : > { %v2516_v53 = vmul.f32 %v3704_v61, %v4602_v25  ;;  %v3709_v25 = vld [vmem:[%s3799_s12 + $0x8] sm:$0xff]  }
 0x3c4   : > { %2628 = vperm.xlu1 %3475, %v2506_v38   ;;  %v2819_v28 = vunpack.c.l.bf16 %v3709_v25  ;;  %v2820_v57 = vunpack.c.h.bf16 %v3709_v25 }
 0x3c5   : > { %2631 = vperm.xlu0 %3476, %v2508_v34   ;;  %v3706_v10 = vpop.eup %3705 }
 0x3c6   : > { %v2514_v14 = vmul.f32 %v3706_v10, %v4586_v55 }
 0x3c8   : > { %2592 = vperm.xlu1 %3475, %v2482_v59  }
 0x3c9   : > { %2595 = vperm.xlu0 %3476, %v2484_v35  }
 0x3cc   : > { %2634 = vperm.xlu1 %3475, %v2510_v40   ;;  %v2827_v40 = vunpack.c.l.bf16 %v4779_v21 }
 0x3cd   : > { %2637 = vperm.xlu0 %3476, %v2512_v51  }
 0x3d0   : > { %2643 = vperm.xlu1 %3475, %v2516_v53   ;;  %v2828_v53 = vunpack.c.h.bf16 %v4779_v21 }
 0x3d1   : > { %2640 = vperm.xlu0 %3476, %v2514_v14  }
 0x406   : > { %v2551_v37 = vpop.permute.xlu1 %2550 }
 0x407   : > { %v2554_v3 = vpop.permute.xlu0 %2553  ;;  %v2881_v6 = vmul.f32 %v2817_v63, %v2551_v37  ;;  %v2648_v48 = vrot.slane %v2551_v37, %v3794_v5 }
 0x408   : > { %v2882_v55 = vmul.f32 %v2818_v7, %v2554_v3  ;;  %v2652_v13 = vrot.slane %v2554_v3, %v3794_v5 }
 0x409   : > { %v2913_v24 = vsel %vm490_vm0, %v2881_v6, 0.0 }
 0x40a   : > { %v2920_v39 = vsel %vm490_vm0, %v2882_v55, 0.0  ;;  %v2914_v49 = vrot.slane %v2913_v24, 4  ;;  %v2557_v50 = vpop.permute.xlu1 %2556  ;;  %v2773_v61 = vsel %vm1677_vm1, %v2652_v13, %v2648_v48 }
 0x40b   : > { %v2921_v41 = vrot.slane %v2920_v39, 4  ;;  %v2563_v16 = vpop.permute.xlu0 %2562  ;;  %v2883_v20 = vmul.f32 %v2819_v28, %v2557_v50  ;;  %v2656_v23 = vrot.slane %v2557_v50, %v3794_v5  ;;  %v4788_v28 = vld [vmem:[%s3799_s12 + $0x60] sm:$0xff]  }
 0x40c   : > { %v2915_v45 = vadd.f32 %v2914_v49, %v2913_v24  ;;  %v2885_v27 = vmul.f32 %v2821_v2, %v2563_v16  ;;  %v2842_v55 = vunpack.c.h.bf16 %v4788_v28  ;;  %v2841_v13 = vunpack.c.l.bf16 %v4788_v28 }
 0x40d   : > { %v2922_v15 = vadd.f32 %v2921_v41, %v2920_v39  ;;  %v2927_v29 = vsel %vm490_vm0, %v2883_v20, 0.0  ;;  %v2774_v6 = vsel %vm1679_vm2, %v2656_v23, %v2773_v61  ;;  %v2664_v39 = vrot.slane %v2563_v16, %v3794_v5 }
 0x40e   : > { %v2916_v31 = vrot.slane %v2915_v45, 2  ;;  %v2941_v30 = vsel %vm490_vm0, %v2885_v27, 0.0  ;;  %v2928_v60 = vrot.slane %v2927_v29, 4  ;;  %v2560_v26 = vpop.permute.xlu1 %2559 }
 0x40f   : > { %v2923_v1 = vrot.slane %v2922_v15, 2  ;;  %v2942_v38 = vrot.slane %v2941_v30, 4  ;;  %v2569_v34 = vpop.permute.xlu0 %2568  ;;  %v2884_v17 = vmul.f32 %v2820_v57, %v2560_v26  ;;  %v2660_v35 = vrot.slane %v2560_v26, %v3794_v5 }
 0x410   : > { %v2929_v59 = vadd.f32 %v2928_v60, %v2927_v29  ;;  %v2887_v56 = vmul.f32 %v2823_v19, %v2569_v34  ;;  %v2917_v51 = vadd.f32 %v2916_v31, %v2915_v45  ;;  %v2672_v23 = vrot.slane %v2569_v34, %v3794_v5 }
 0x411   : > { %v2934_v10 = vsel %vm490_vm0, %v2884_v17, 0.0  ;;  %v2924_v14 = vadd.f32 %v2923_v1, %v2922_v15  ;;  %v2943_v3 = vadd.f32 %v2942_v38, %v2941_v30  ;;  %v2775_v2 = vsel %vm1681_vm3, %v2660_v35, %v2774_v6  ;;  %v4798_v15 = vld [vmem:[%s3799_s12 + $0x30] sm:$0xff]  }
 0x412   : > { %v2930_v11 = vrot.slane %v2929_v59, 2  ;;  %v2955_v63 = vsel %vm490_vm0, %v2887_v56, 0.0  ;;  %v2935_v7 = vrot.slane %v2934_v10, 4  ;;  %v2566_v37 = vpop.permute.xlu1 %2565  ;;  %v2918_v24 = vrot.slane %v2917_v51, 1 }
 0x413   : > { %v2956_v25 = vrot.slane %v2955_v63, 4  ;;  %v2668_v57 = vrot.slane %v2566_v37, %v3794_v5  ;;  %v2886_v50 = vmul.f32 %v2822_v9, %v2566_v37  ;;  %v2925_v41 = vrot.slane %v2924_v14, 1 }
 0x414   : > { %v2931_v47 = vadd.f32 %v2930_v11, %v2929_v59  ;;  %v2936_v19 = vadd.f32 %v2935_v7, %v2934_v10  ;;  %v2830_v48 = vunpack.c.h.bf16 %v4798_v15  ;;  %v2944_v29 = vrot.slane %v2943_v3, 2 }
 0x415   : > { %v2957_v49 = vadd.f32 %v2956_v25, %v2955_v63  ;;  %v2776_v31 = vsel %vm1683_vm4, %v2664_v39, %v2775_v2  ;;  %v2948_v30 = vsel %vm490_vm0, %v2886_v50, 0.0  ;;  %v2829_v16 = vunpack.c.l.bf16 %v4798_v15  ;;  %v3719_v2 = vld [vmem:[%s3818_s16] sm:$0xff] }
 0x416   : > { %v2937_v20 = vrot.slane %v2936_v19, 2  ;;  %v4794_v45 = vpop.permute.xlu0 %2601  ;;  %v2572_v27 = vpop.permute.xlu1 %2571  ;;  %v2932_v9 = vrot.slane %v2931_v47, 1  ;;  %v2777_v26 = vsel %vm1685_vm5, %v2668_v57, %v2776_v31  ;;  %v2949_v1 = vrot.slane %v2948_v30, 4 }
 0x417   : > { %v2919_v38 = vadd.f32 %v2918_v24, %v2917_v51  ;;  %v2958_v17 = vrot.slane %v2957_v49, 2  ;;  %v2898_v59 = vmul.f32 %v2834_v22, %v4794_v45  ;;  %v2926_v56 = vadd.f32 %v2925_v41, %v2924_v14  ;;  %v4841_v41 = vld [vmem:[%s3799_s12 + $0x68] sm:$0xff]  }
 0x418   : > { %v2938_v60 = vadd.f32 %v2937_v20, %v2936_v19  ;;  %v2950_v61 = vadd.f32 %v2949_v1, %v2948_v30  ;;  %v2676_v51 = vrot.slane %v2572_v27, %v3794_v5  ;;  %v2945_v11 = vadd.f32 %v2944_v29, %v2943_v3 }
 0x419   : > { %v3032_v63 = vsel %vm490_vm0, %v2898_v59, 0.0  ;;  %v2778_v22 = vsel %vm1687_vm6, %v2672_v23, %v2777_v26  ;;  %v2888_v14 = vmul.f32 %v2824_v18, %v2572_v27  ;;  %v2933_v7 = vadd.f32 %v2932_v9, %v2931_v47 }
 0x41a   : > { %v2939_v35 = vrot.slane %v2938_v60, 1  ;;  %v4816_v10 = vpop.permute.xlu0 %2604  ;;  %v2599_v34 = vpop.permute.xlu1 %2598  ;;  %v2951_v37 = vrot.slane %v2950_v61, 2  ;;  %v3033_v6 = vrot.slane %v3032_v63, 4  ;;  %v2779_v25 = vsel %vm1689_vm7, %v2676_v51, %v2778_v22 }
 0x41b   : > { %v2959_v3 = vadd.f32 %v2958_v17, %v2957_v49  ;;  %2805 = vst.msk [vmem:[%s4813_s25] sm:$0xff] %vm1716_vm8, %v2779_v25  ;;  %v2809_v19 = vadd.f32 %v3719_v2, %v2779_v25  ;;  %v2962_v42 = vsel %vm490_vm0, %v2888_v14, 0.0  ;;  %v2899_v18 = vmul.f32 %v2835_v33, %v4816_v10 }
 0x41c   : > { %v2940_v47 = vadd.f32 %v2939_v35, %v2938_v60  ;;  %v2952_v57 = vadd.f32 %v2951_v37, %v2950_v61  ;;  %v2963_v24 = vrot.slane %v2962_v42, 4  ;;  %v2844_v49 = vunpack.c.h.bf16 %v4841_v41 }
 0x41d   : > { %v3169_v20 = vsel %vm1677_vm1, %v2926_v56, %v2919_v38  ;;  %v2946_v27 = vrot.slane %v2945_v11, 1  ;;  %2813 = vst.msk [vmem:[%s4826_s28] sm:$0xff] %vm1716_vm8, %v2809_v19  ;;  %v3039_v29 = vsel %vm490_vm0, %v2899_v18, 0.0  ;;  %v2897_v33 = vmul.f32 %v2833_v0, %v2599_v34 }
 0x41e   : > { %v4836_v39 = vpop.permute.xlu0 %2607  ;;  %v4838_v50 = vpop.permute.xlu1 %2610  ;;  %v2953_v31 = vrot.slane %v2952_v57, 1  ;;  %v3034_v30 = vadd.f32 %v3033_v6, %v3032_v63  ;;  %v2964_v9 = vadd.f32 %v2963_v24, %v2962_v42  ;;  %v3040_v60 = vrot.slane %v3039_v29, 4 }
 0x41f   : > { %v3170_v26 = vsel %vm1679_vm2, %v2933_v7, %v3169_v20  ;;  %v2960_v1 = vrot.slane %v2959_v3, 1  ;;  %v3025_v23 = vsel %vm490_vm0, %v2897_v33, 0.0  ;;  %v2900_v38 = vmul.f32 %v2836_v36, %v4836_v39 }
 0x420   : > { %v3171_v17 = vsel %vm1681_vm3, %v2940_v47, %v3170_v26  ;;  %v2954_v59 = vadd.f32 %v2953_v31, %v2952_v57  ;;  %v2965_v56 = vrot.slane %v2964_v9, 2  ;;  %v3041_v35 = vadd.f32 %v3040_v60, %v3039_v29 }
 0x421   : > { %v2947_v62 = vadd.f32 %v2946_v27, %v2945_v11  ;;  %v2712_v0 = vrot.slane %v2599_v34, %v3794_v5  ;;  %v3026_v61 = vrot.slane %v3025_v23, 4  ;;  %v3046_v51 = vsel %vm490_vm0, %v2900_v38, 0.0 }
 0x422   : > { %v4858_v63 = vpop.permute.xlu1 %2616  ;;  %v2716_v22 = vrot.slane %v4794_v45, %v3794_v5  ;;  %v3035_v14 = vrot.slane %v3034_v30, 2  ;;  %v2966_v7 = vadd.f32 %v2965_v56, %v2964_v9  ;;  %v2843_v46 = vunpack.c.l.bf16 %v4841_v41  ;;  %v2614_v6 = vpop.permute.xlu0 %2613 }
 0x423   : > { %v3172_v36 = vsel %vm1683_vm4, %v2947_v62, %v3171_v17  ;;  %v2720_v11 = vrot.slane %v4816_v10, %v3794_v5  ;;  %v3027_v37 = vadd.f32 %v3026_v61, %v3025_v23  ;;  %v3047_v34 = vrot.slane %v3046_v51, 4 }
 0x424   : > { %v2961_v25 = vadd.f32 %v2960_v1, %v2959_v3  ;;  %v3173_v2 = vsel %vm1685_vm5, %v2954_v59, %v3172_v36  ;;  %v2967_v19 = vrot.slane %v2966_v7, 1  ;;  %v3042_v42 = vrot.slane %v3041_v35, 2 }
 0x425   : > { %v2787_v45 = vsel %vm1677_vm1, %v2716_v22, %v2712_v0  ;;  %v3028_v18 = vrot.slane %v3027_v37, 2  ;;  %v3048_v47 = vadd.f32 %v3047_v34, %v3046_v51  ;;  %v2901_v57 = vmul.f32 %v2837_v8, %v4838_v50  ;;  %v4903_v34 = vld [vmem:[%s3799_s12 + $0x38] sm:$0xff]  }
 0x426   : > { %v3036_v24 = vadd.f32 %v3035_v14, %v3034_v30  ;;  %v2968_v10 = vadd.f32 %v2967_v19, %v2966_v7  ;;  %v2724_v3 = vrot.slane %v4836_v39, %v3794_v5  ;;  %v2902_v20 = vmul.f32 %v2838_v44, %v2614_v6  ;;  %v4883_v31 = vpop.permute.xlu1 %2619 }
 0x427   : > { %v3174_v27 = vsel %vm1687_vm6, %v2961_v25, %v3173_v2  ;;  %v3029_v29 = vadd.f32 %v3028_v18, %v3027_v37  ;;  %v3049_v33 = vrot.slane %v3048_v47, 2  ;;  %v3053_v8 = vsel %vm490_vm0, %v2901_v57, 0.0 }
 0x428   : > { %v3175_v30 = vsel %vm1689_vm7, %v2968_v10, %v3174_v27  ;;  %v3043_v9 = vadd.f32 %v3042_v42, %v3041_v35  ;;  %v3054_v60 = vrot.slane %v3053_v8, 4  ;;  %v3060_v26 = vsel %vm490_vm0, %v2902_v20, 0.0 }
 0x429   : > { %3201 = vst.msk [vmem:[%s4875_s8] sm:$0xff] %vm490_vm0, %v3175_v30  ;;  %v3030_v39 = vrot.slane %v3029_v29, 1  ;;  %v2788_v54 = vsel %vm1679_vm2, %v2720_v11, %v2787_v45  ;;  %v3050_v44 = vadd.f32 %v3049_v33, %v3048_v47  ;;  %v3061_v1 = vrot.slane %v3060_v26, 4 }
 0x42a   : > { %v3037_v23 = vrot.slane %v3036_v24, 1  ;;  %v3055_v38 = vadd.f32 %v3054_v60, %v3053_v8  ;;  %v2903_v17 = vmul.f32 %v2839_v43, %v4858_v63  ;;  %v2904_v59 = vmul.f32 %v2840_v52, %v4883_v31  ;;  %v4917_v8 = vld [vmem:[%s3799_s12 + $0x70] sm:$0xff]  }
 0x42b   : > { %v2789_v56 = vsel %vm1681_vm3, %v2724_v3, %v2788_v54  ;;  %v2728_v35 = vrot.slane %v4838_v50, %v3794_v5  ;;  %v2732_v62 = vrot.slane %v2614_v6, %v3794_v5  ;;  %v3062_v0 = vadd.f32 %v3061_v1, %v3060_v26 }
 0x42c   : > { %v3044_v61 = vrot.slane %v3043_v9, 1  ;;  %v3056_v51 = vrot.slane %v3055_v38, 2  ;;  %v3067_v22 = vsel %vm490_vm0, %v2903_v17, 0.0  ;;  %v3074_v14 = vsel %vm490_vm0, %v2904_v59, 0.0 }
 0x42d   : > { %v3031_v43 = vadd.f32 %v3030_v39, %v3029_v29  ;;  %v3051_v7 = vrot.slane %v3050_v44, 1  ;;  %v3063_v36 = vrot.slane %v3062_v0, 2  ;;  %v3068_v4 = vrot.slane %v3067_v22, 4  ;;  %v4924_v39 = vld [vmem:[%s3799_s12 + $0x78] sm:$0xff]  }
 0x42e   : > { %v3038_v52 = vadd.f32 %v3037_v23, %v3036_v24  ;;  %v3057_v11 = vadd.f32 %v3056_v51, %v3055_v38  ;;  %v3075_v37 = vrot.slane %v3074_v14, 4  ;;  %v2832_v50 = vunpack.c.h.bf16 %v4903_v34 }
 0x42f   : > { %v2790_v6 = vsel %vm1683_vm4, %v2728_v35, %v2789_v56  ;;  %v3064_v25 = vadd.f32 %v3063_v36, %v3062_v0  ;;  %v2736_v2 = vrot.slane %v4858_v63, %v3794_v5  ;;  %v3069_v19 = vadd.f32 %v3068_v4, %v3067_v22 }
 0x430   : > { %v3045_v42 = vadd.f32 %v3044_v61, %v3043_v9  ;;  %v3058_v45 = vrot.slane %v3057_v11, 1  ;;  %v2791_v18 = vsel %vm1685_vm5, %v2732_v62, %v2790_v6  ;;  %v3076_v47 = vadd.f32 %v3075_v37, %v3074_v14 }
 0x431   : > { %v3183_v57 = vsel %vm1677_vm1, %v3038_v52, %v3031_v43  ;;  %v3052_v24 = vadd.f32 %v3051_v7, %v3050_v44  ;;  %v3065_v10 = vrot.slane %v3064_v25, 1  ;;  %v2740_v3 = vrot.slane %v4883_v31, %v3794_v5 }
 0x432   : > { %v3070_v27 = vrot.slane %v3069_v19, 2  ;;  %v2831_v33 = vunpack.c.l.bf16 %v4903_v34  ;;  %v2846_v30 = vunpack.c.h.bf16 %v4917_v8  ;;  %v3077_v9 = vrot.slane %v3076_v47, 2 }
 0x433   : > { %v2578_v20 = vpop.permute.xlu1 %2577  ;;  %v2845_v26 = vunpack.c.l.bf16 %v4917_v8  ;;  %v2847_v31 = vunpack.c.l.bf16 %v4924_v39  ;;  %v3184_v54 = vsel %vm1679_vm2, %v3045_v42, %v3183_v57  ;;  %v3059_v44 = vadd.f32 %v3058_v45, %v3057_v11  ;;  %v3724_v11 = vld [vmem:[%s3818_s16 + $0x10] sm:$0xff] }
 0x434   : > { %v2575_v29 = vpop.permute.xlu0 %2574  ;;  %v2890_v63 = vmul.f32 %v2826_v12, %v2578_v20  ;;  %v2792_v12 = vsel %vm1687_vm6, %v2736_v2, %v2791_v18  ;;  %v3185_v23 = vsel %vm1681_vm3, %v3052_v24, %v3184_v54  ;;  %v3066_v38 = vadd.f32 %v3065_v10, %v3064_v25 }
 0x435   : > { %v2889_v60 = vmul.f32 %v2825_v58, %v2575_v29  ;;  %v4932_v17 = vsel %vm1689_vm7, %v2740_v3, %v2792_v12  ;;  %v3071_v59 = vadd.f32 %v3070_v27, %v3069_v19  ;;  %v2684_v35 = vrot.slane %v2578_v20, %v3794_v5 }
 0x436   : > { %v2976_v1 = vsel %vm490_vm0, %v2890_v63, 0.0  ;;  %v3078_v61 = vadd.f32 %v3077_v9, %v3076_v47  ;;  %v2680_v51 = vrot.slane %v2575_v29, %v3794_v5  ;;  %v3186_v43 = vsel %vm1683_vm4, %v3059_v44, %v3185_v23  ;;  %2807 = vst.msk [vmem:[%s4813_s25 + $0x10] sm:$0xff] %vm1716_vm8, %v4932_v17 }
 0x437   : > { %v2969_v32 = vsel %vm490_vm0, %v2889_v60, 0.0  ;;  %v4935_v58 = vpop.permute.xlu1 %2583  ;;  %v2977_v62 = vrot.slane %v2976_v1, 4  ;;  %v2848_v4 = vunpack.c.h.bf16 %v4924_v39  ;;  %v3187_v52 = vsel %vm1685_vm5, %v3066_v38, %v3186_v43 }
 0x438   : > { %v2970_v56 = vrot.slane %v2969_v32, 4  ;;  %v2581_v0 = vpop.permute.xlu0 %2580  ;;  %v2892_v14 = vmul.f32 %v2828_v53, %v4935_v58  ;;  %v4949_v37 = vadd.f32 %v3724_v11, %v4932_v17  ;;  %v3072_v2 = vrot.slane %v3071_v59, 1 }
 0x439   : > { %v2891_v22 = vmul.f32 %v2827_v40, %v2581_v0  ;;  %v2978_v36 = vadd.f32 %v2977_v62, %v2976_v1  ;;  %v3079_v45 = vrot.slane %v3078_v61, 1  ;;  %v2780_v18 = vsel %vm1677_vm1, %v2684_v35, %v2680_v51 }
 0x43a   : > { %v2971_v7 = vadd.f32 %v2970_v56, %v2969_v32  ;;  %v2990_v40 = vsel %vm490_vm0, %v2892_v14, 0.0  ;;  %v2688_v3 = vrot.slane %v2581_v0, %v3794_v5  ;;  %v2692_v27 = vrot.slane %v4935_v58, %v3794_v5  ;;  %2815 = vst.msk [vmem:[%s4826_s28 + $0x10] sm:$0xff] %vm1716_vm8, %v4949_v37 }
 0x43b   : > { %v2983_v6 = vsel %vm490_vm0, %v2891_v22, 0.0  ;;  %v2623_v25 = vpop.permute.xlu1 %2622  ;;  %v2979_v53 = vrot.slane %v2978_v36, 2  ;;  %v2991_v47 = vrot.slane %v2990_v40, 4  ;;  %v3073_v54 = vadd.f32 %v3072_v2, %v3071_v59 }
 0x43c   : > { %v2972_v21 = vrot.slane %v2971_v7, 2  ;;  %v2984_v19 = vrot.slane %v2983_v6, 4  ;;  %v2626_v42 = vpop.permute.xlu0 %2625  ;;  %v2905_v9 = vmul.f32 %v2841_v13, %v2623_v25  ;;  %v4964_v23 = vadd.f32 %v3079_v45, %v3078_v61 }
 0x43d   : > { %v2906_v57 = vmul.f32 %v2842_v55, %v2626_v42  ;;  %v2980_v10 = vadd.f32 %v2979_v53, %v2978_v36  ;;  %v2992_v29 = vadd.f32 %v2991_v47, %v2990_v40  ;;  %v2781_v58 = vsel %vm1679_vm2, %v2688_v3, %v2780_v18 }
 0x43e   : > { %v2973_v24 = vadd.f32 %v2972_v21, %v2971_v7  ;;  %v2985_v20 = vadd.f32 %v2984_v19, %v2983_v6  ;;  %v3081_v56 = vsel %vm490_vm0, %v2905_v9, 0.0  ;;  %v2748_v62 = vrot.slane %v2626_v42, %v3794_v5 }
 0x43f   : > { %v3088_v63 = vsel %vm490_vm0, %v2906_v57, 0.0  ;;  %v2587_v60 = vpop.permute.xlu1 %2586  ;;  %v2981_v38 = vrot.slane %v2980_v10, 1  ;;  %v2993_v32 = vrot.slane %v2992_v29, 2  ;;  %v2744_v59 = vrot.slane %v2623_v25, %v3794_v5 }
 0x440   : > { %v2974_v44 = vrot.slane %v2973_v24, 1  ;;  %v2986_v12 = vrot.slane %v2985_v20, 2  ;;  %v3089_v1 = vrot.slane %v3088_v63, 4  ;;  %v4962_v55 = vpop.permute.xlu0 %2589  ;;  %v3082_v0 = vrot.slane %v3081_v56, 4 }
 0x441   : > { %v2994_v13 = vadd.f32 %v2993_v32, %v2992_v29  ;;  %v2894_v51 = vmul.f32 %v2830_v48, %v4962_v55  ;;  %v2893_v43 = vmul.f32 %v2829_v16, %v2587_v60  ;;  %v2982_v36 = vadd.f32 %v2981_v38, %v2980_v10 }
 0x442   : > { %v2987_v35 = vadd.f32 %v2986_v12, %v2985_v20  ;;  %v3090_v28 = vadd.f32 %v3089_v1, %v3088_v63  ;;  %v2975_v61 = vadd.f32 %v2974_v44, %v2973_v24  ;;  %v3083_v11 = vadd.f32 %v3082_v0, %v3081_v56 }
 0x443   : > { %v3004_v6 = vsel %vm490_vm0, %v2894_v51, 0.0  ;;  %v2696_v40 = vrot.slane %v2587_v60, %v3794_v5  ;;  %v2629_v25 = vpop.permute.xlu1 %2628  ;;  %v4980_v2 = vsel %vm1687_vm6, %v3073_v54, %v3187_v52  ;;  %v2995_v21 = vrot.slane %v2994_v13, 1 }
 0x444   : > { %v2988_v22 = vrot.slane %v2987_v35, 1  ;;  %v3091_v14 = vrot.slane %v3090_v28, 2  ;;  %v4975_v7 = vpop.permute.xlu0 %2631  ;;  %v3005_v48 = vrot.slane %v3004_v6, 4  ;;  %v2997_v53 = vsel %vm490_vm0, %v2893_v43, 0.0 }
 0x445   : > { %v2782_v19 = vsel %vm1681_vm3, %v2692_v27, %v2781_v58  ;;  %v2794_v15 = vsel %vm1677_vm1, %v2748_v62, %v2744_v59  ;;  %v3084_v16 = vrot.slane %v3083_v11, 2  ;;  %v2998_v42 = vrot.slane %v2997_v53, 4 }
 0x446   : > { %v2989_v45 = vadd.f32 %v2988_v22, %v2987_v35  ;;  %v3092_v18 = vadd.f32 %v3091_v14, %v3090_v28  ;;  %v3006_v47 = vadd.f32 %v3005_v48, %v3004_v6  ;;  %v2908_v57 = vmul.f32 %v2844_v49, %v4975_v7  ;;  %v3725_v48 = vld [vmem:[%s3818_s16 + $0x8] sm:$0xff] }
 0x447   : > { %v3176_v52 = vsel %vm1677_vm1, %v2982_v36, %v2975_v61  ;;  %v2700_v10 = vrot.slane %v4962_v55, %v3794_v5  ;;  %v2783_v3 = vsel %vm1683_vm4, %v2696_v40, %v2782_v19  ;;  %v2999_v20 = vadd.f32 %v2998_v42, %v2997_v53  ;;  %v2593_v12 = vpop.permute.xlu1 %2592 }
 0x448   : > { %v2596_v24 = vpop.permute.xlu0 %2595  ;;  %v2996_v27 = vadd.f32 %v2995_v21, %v2994_v13  ;;  %v3085_v29 = vadd.f32 %v3084_v16, %v3083_v11  ;;  %v3102_v63 = vsel %vm490_vm0, %v2908_v57, 0.0  ;;  %v2907_v9 = vmul.f32 %v2843_v46, %v2629_v25 }
 0x449   : > { %v3007_v60 = vrot.slane %v3006_v47, 2  ;;  %v3000_v54 = vrot.slane %v2999_v20, 2  ;;  %v2756_v49 = vrot.slane %v4975_v7, %v3794_v5  ;;  %v3103_v44 = vrot.slane %v3102_v63, 4 }
 0x44a   : > { %v3177_v1 = vsel %vm1679_vm2, %v2989_v45, %v3176_v52  ;;  %v3093_v55 = vrot.slane %v3092_v18, 1  ;;  %v3095_v38 = vsel %vm490_vm0, %v2907_v9, 0.0  ;;  %v2896_v32 = vmul.f32 %v2832_v50, %v2596_v24 }
 0x44b   : > { %v3001_v56 = vadd.f32 %v3000_v54, %v2999_v20  ;;  %v3104_v58 = vadd.f32 %v3103_v44, %v3102_v63  ;;  %v3096_v35 = vrot.slane %v3095_v38, 4  ;;  %v2708_v41 = vrot.slane %v2596_v24, %v3794_v5  ;;  %v2635_v34 = vpop.permute.xlu1 %2634 }
 0x44c   : > { %v2638_v46 = vpop.permute.xlu0 %2637  ;;  %v3086_v62 = vrot.slane %v3085_v29, 1  ;;  %v2752_v28 = vrot.slane %v2629_v25, %v3794_v5  ;;  %v3018_v13 = vsel %vm490_vm0, %v2896_v32, 0.0  ;;  %v2704_v59 = vrot.slane %v2593_v12, %v3794_v5 }
 0x44d   : > { %v3008_v0 = vadd.f32 %v3007_v60, %v3006_v47  ;;  %v3002_v51 = vrot.slane %v3001_v56, 1  ;;  %v3097_v61 = vadd.f32 %v3096_v35, %v3095_v38  ;;  %v2784_v50 = vsel %vm1685_vm5, %v2700_v10, %v2783_v3 }
 0x44e   : > { %v3105_v22 = vrot.slane %v3104_v58, 2  ;;  %v3019_v14 = vrot.slane %v3018_v13, 4  ;;  %v2785_v43 = vsel %vm1687_vm6, %v2704_v59, %v2784_v50  ;;  %v2895_v7 = vmul.f32 %v2831_v33, %v2593_v12 }
 0x44f   : > { %v3178_v36 = vsel %vm1681_vm3, %v2996_v27, %v3177_v1  ;;  %v3094_v11 = vadd.f32 %v3093_v55, %v3092_v18  ;;  %v3098_v6 = vrot.slane %v3097_v61, 2  ;;  %v2786_v40 = vsel %vm1689_vm7, %v2708_v41, %v2785_v43 }
 0x450   : > { %v2795_v25 = vsel %vm1679_vm2, %v2752_v28, %v2794_v15  ;;  %v3020_v21 = vadd.f32 %v3019_v14, %v3018_v13  ;;  %2806 = vst.msk [vmem:[%s4813_s25 + $0x8] sm:$0xff] %vm1716_vm8, %v2786_v40  ;;  %v2810_v53 = vadd.f32 %v3725_v48, %v2786_v40  ;;  %v3011_v19 = vsel %vm490_vm0, %v2895_v7, 0.0  ;;  %v2641_v18 = vpop.permute.xlu0 %2640 }
 0x451   : > { %v3087_v33 = vadd.f32 %v3086_v62, %v3085_v29  ;;  %v3009_v16 = vrot.slane %v3008_v0, 1  ;;  %v3003_v42 = vadd.f32 %v3002_v51, %v3001_v56  ;;  %v3012_v45 = vrot.slane %v3011_v19, 4 }
 0x452   : > { %v3106_v47 = vadd.f32 %v3105_v22, %v3104_v58  ;;  %v3099_v15 = vadd.f32 %v3098_v6, %v3097_v61  ;;  %v3021_v57 = vrot.slane %v3020_v21, 2  ;;  %2814 = vst.msk [vmem:[%s4826_s28 + $0x8] sm:$0xff] %vm1716_vm8, %v2810_v53  ;;  %v2910_v24 = vmul.f32 %v2846_v30, %v2638_v46 }
 0x453   : > { %v3013_v52 = vadd.f32 %v3012_v45, %v3011_v19  ;;  %v2764_v10 = vrot.slane %v2638_v46, %v3794_v5  ;;  %v2796_v3 = vsel %vm1681_vm3, %v2756_v49, %v2795_v25  ;;  %v2760_v20 = vrot.slane %v2635_v34, %v3794_v5 }
 0x454   : > { %v3022_v17 = vadd.f32 %v3021_v57, %v3020_v21  ;;  %v3116_v27 = vsel %vm490_vm0, %v2910_v24, 0.0  ;;  %v2909_v29 = vmul.f32 %v2845_v26, %v2635_v34  ;;  %v2768_v63 = vrot.slane %v2641_v18, %v3794_v5  ;;  %v2644_v26 = vpop.permute.xlu1 %2643 }
 0x455   : > { %v3010_v9 = vadd.f32 %v3009_v16, %v3008_v0  ;;  %v3014_v30 = vrot.slane %v3013_v52, 2  ;;  %v3117_v60 = vrot.slane %v3116_v27, 4  ;;  %v2797_v54 = vsel %vm1683_vm4, %v2760_v20, %v2796_v3 }
 0x456   : > { %v3100_v37 = vrot.slane %v3099_v15, 1  ;;  %v3023_v44 = vrot.slane %v3022_v17, 1  ;;  %v3109_v12 = vsel %vm490_vm0, %v2909_v29, 0.0  ;;  %v2911_v49 = vmul.f32 %v2847_v31, %v2641_v18 }
 0x457   : > { %v3015_v1 = vadd.f32 %v3014_v30, %v3013_v52  ;;  %v3118_v55 = vadd.f32 %v3117_v60, %v3116_v27  ;;  %v3110_v38 = vrot.slane %v3109_v12, 4  ;;  %v2798_v8 = vsel %vm1685_vm5, %v2764_v10, %v2797_v54 }
 0x458   : > { %v3179_v32 = vsel %vm1683_vm4, %v3003_v42, %v3178_v36  ;;  %v3107_v56 = vrot.slane %v3106_v47, 1  ;;  %v2799_v58 = vsel %vm1687_vm6, %v2768_v63, %v2798_v8  ;;  %v3123_v35 = vsel %vm490_vm0, %v2911_v49, 0.0 }
 0x459   : > { %v3016_v41 = vrot.slane %v3015_v1, 1  ;;  %v3119_v46 = vrot.slane %v3118_v55, 2  ;;  %v3111_v62 = vadd.f32 %v3110_v38, %v3109_v12  ;;  %v3124_v28 = vrot.slane %v3123_v35, 4 }
 0x45a   : > { %v3101_v13 = vadd.f32 %v3100_v37, %v3099_v15  ;;  %v3024_v31 = vadd.f32 %v3023_v44, %v3022_v17  ;;  %v2772_v59 = vrot.slane %v2644_v26, %v3794_v5  ;;  %v2912_v0 = vmul.f32 %v2848_v4, %v2644_v26 }
 0x45b   : > { %v3017_v51 = vadd.f32 %v3016_v41, %v3015_v1  ;;  %v3120_v61 = vadd.f32 %v3119_v46, %v3118_v55  ;;  %v3112_v50 = vrot.slane %v3111_v62, 2  ;;  %v3125_v22 = vadd.f32 %v3124_v28, %v3123_v35 }
 0x45c   : > { %v3190_v14 = vsel %vm1677_vm1, %v3094_v11, %v3087_v33  ;;  %v3180_v43 = vsel %vm1685_vm5, %v3010_v9, %v3179_v32  ;;  %v2800_v7 = vsel %vm1689_vm7, %v2772_v59, %v2799_v58  ;;  %v3130_v36 = vsel %vm490_vm0, %v2912_v0, 0.0  ;;  %v3726_v11 = vld [vmem:[%s3818_s16 + $0x18] sm:$0xff] }
 0x45d   : > { %v3108_v6 = vadd.f32 %v3107_v56, %v3106_v47  ;;  %v3181_v5 = vsel %vm1687_vm6, %v3017_v51, %v3180_v43  ;;  %v3113_v39 = vadd.f32 %v3112_v50, %v3111_v62  ;;  %v3126_v4 = vrot.slane %v3125_v22, 2  ;;  %2808 = vst.msk [vmem:[%s4813_s25 + $0x18] sm:$0xff] %vm1716_vm8, %v2800_v7 }
 0x45e   : > { %v3182_v40 = vsel %vm1689_vm7, %v3024_v31, %v3181_v5  ;;  %v3121_v25 = vrot.slane %v3120_v61, 1  ;;  %v2812_v21 = vadd.f32 %v3726_v11, %v2800_v7  ;;  %v3131_v48 = vrot.slane %v3130_v36, 4 }
 0x45f   : > { %v3189_v53 = vsel %vm1689_vm7, %v4964_v23, %v4980_v2  ;;  %v3191_v19 = vsel %vm1679_vm2, %v3101_v13, %v3190_v14  ;;  %3202 = vst.msk [vmem:[%s4875_s8 + $0x8] sm:$0xff] %vm490_vm0, %v3182_v40  ;;  %v3114_v34 = vrot.slane %v3113_v39, 1  ;;  %v3127_v33 = vadd.f32 %v3126_v4, %v3125_v22 }
 0x460   : > { %3203 = vst.msk [vmem:[%s4875_s8 + $0x10] sm:$0xff] %vm490_vm0, %v3189_v53  ;;  %v3132_v16 = vadd.f32 %v3131_v48, %v3130_v36  ;;  %v3122_v18 = vadd.f32 %v3121_v25, %v3120_v61  ;;  %v3192_v47 = vsel %vm1681_vm3, %v3108_v6, %v3191_v19 }
 0x461   : > { %2816 = vst.msk [vmem:[%s4826_s28 + $0x18] sm:$0xff] %vm1716_vm8, %v2812_v21  ;;  %v3115_v42 = vadd.f32 %v3114_v34, %v3113_v39  ;;  %v3128_v45 = vrot.slane %v3127_v33, 1 }
 0x462   : > { %v3133_v15 = vrot.slane %v3132_v16, 2 }
 0x463   : > { %v3193_v23 = vsel %vm1683_vm4, %v3115_v42, %v3192_v47  ;;  %v3129_v2 = vadd.f32 %v3128_v45, %v3127_v33 }
 0x464   : > { %v3134_v57 = vadd.f32 %v3133_v15, %v3132_v16  ;;  %v3194_v24 = vsel %vm1685_vm5, %v3122_v18, %v3193_v23 }
 0x465   : > { %v3195_v10 = vsel %vm1687_vm6, %v3129_v2, %v3194_v24 }
 0x466   : > { %v3135_v52 = vrot.slane %v3134_v57, 1 }
 0x468   : > { %v3136_v3 = vadd.f32 %v3135_v52, %v3134_v57 }
 0x46a   : > { %v3196_v20 = vsel %vm1689_vm7, %v3136_v3, %v3195_v10 }
 0x46b   : > { %3204 = vst.msk [vmem:[%s4875_s8 + $0x18] sm:$0xff] %vm490_vm0, %v3196_v20 }
 0x46c PF: > { %s18_s24 = sadd.s32 1, %s3733_s24  }
 0x46d   : > { %p15_p5 = scmp.ge.s32.totalorder %s18_s24, 4  }
 0x46f   :  { %17 = sbr.rel (!%p15_p5) target bundleno = 1 (0x1), region = 100 }

</bundles_post_ra>
